<compile_context>
chip_gen: v6e
topology: v6e:2x2x1
jax: 0.10.0
libtpu: 0.0.40
codegen_flags: <defaults>
</compile_context>

<pallas_src>
import functools

import jax
import jax.numpy as jnp
from jax.experimental import pallas as pl
from jax.experimental.pallas import tpu as pltpu


# ----------------------------- Pallas kernels -----------------------------

def _conv_down_kernel(p00_ref, p01_ref, p10_ref, p11_ref, w_ref, b_ref,
                      o_ref, acc_ref, *, wh):
    """One (batch, row-tile, cout-tile) step of the stride-2 3x3 conv.

    p00/p01 : (1, 1, (th+2)*Wh, Cin)  bf16  flattened even-row phases (+halo rows)
    p10/p11 : (1, 1, (th+1)*Wh, Cin)  bf16  flattened odd-row phases  (+1 slack row)
    w_ref   : (3, 3, Cin, tn)         bf16  HWIO weight tile
    b_ref   : (1, tn)                 f32   bias tile
    o_ref   : (1, 1, th*Wh, tn)             flat output tile (column Wh-1 is junk)
    acc_ref : (th*Wh, tn)             f32   scratch accumulator
    """
    m = o_ref.shape[2]
    phase_refs = ((p00_ref, p01_ref), (p10_ref, p11_ref))

    first = True
    for dy in range(3):
        a, oy = dy % 2, dy // 2
        for dx in range(3):
            b, ox = dx % 2, dx // 2
            off = oy * wh + ox
            # Contiguous flat window -> (M, Cin) lhs, no reshape needed.
            lhs = phase_refs[a][b][0, 0, off:off + m, :]
            tap = jnp.dot(lhs, w_ref[dy, dx], preferred_element_type=jnp.float32)
            if first:
                acc_ref[...] = tap
                first = False
            else:
                acc_ref[...] += tap

    o_ref[0, 0] = (acc_ref[...] + b_ref[...]).astype(o_ref.dtype)


def _pool_down_kernel(x_ref, o_ref):
    """2x2 / stride-2 average pool on one row-tile.

    x_ref : (1, th, 2, Wo, 2*C)  view with x_ref[0, i, a, j, b*C + c] == x[2i+a, 2j+b, c]
    o_ref : (1, th, Wo, C)
    """
    c = o_ref.shape[-1]
    s = (x_ref[0, :, 0, :, :].astype(jnp.float32)
         + x_ref[0, :, 1, :, :].astype(jnp.float32))          # even rows + odd rows
    o_ref[0] = ((s[:, :, :c] + s[:, :, c:]) * 0.25).astype(o_ref.dtype)


# ----------------------------- tile selection -----------------------------

def _pick_cout_tile(cin, cout):
    # Lane-dense output tiles; keep the (3,3,Cin,tn) bf16 weight block small enough
    # to double-buffer comfortably (v5e: 16 MiB default scoped VMEM).
    for tn in (256, 128):
        if cout % tn == 0 and 9 * cin * tn * 2 <= 4 * 1024 * 1024:
            return tn
    if cout % 128 == 0:
        return 128
    return cout


def _pick_conv_row_tile(ho, wh, cin, tn, out_itemsize):
    # Bound the single-buffered per-step footprint (4 bf16 phase blocks + f32
    # scratch accumulator + output block) to ~3 MB; Pallas double-buffers on top.
    budget = 3 * 1024 * 1024
    per_row = 4 * wh * cin * 2 + wh * tn * (4 + out_itemsize)
    return max(1, min(ho, budget // max(per_row, 1)))


def _pick_pool_row_tile(ho, wo, c, itemsize):
    budget = 4 * 1024 * 1024
    per_row = 5 * wo * c * itemsize          # 4*Wo*C input + Wo*C output per out-row
    return max(1, min(ho, budget // max(per_row, 1)))


# ----------------------------- wrappers -----------------------------

def downsample_conv_pallas(x_nhwc, w_hwio, bias, padding=1):
    """3x3 conv, stride 2, zero padding, NHWC activations, HWIO weights.
    PyTorch floor output-size semantics; odd spatial sizes supported."""
    N, H, W, Cin = x_nhwc.shape
    Cout = w_hwio.shape[-1]
    Ho = (H + 2 * padding - 3) // 2 + 1
    Wo = (W + 2 * padding - 3) // 2 + 1
    assert Ho >= 1 and Wo >= 1
    Hp, Wp = H + 2 * padding, W + 2 * padding

    # Zero-pad (bf16); one extra bottom/right row/col when the padded size is odd so
    # the even/odd phase split is exact (the extra zeros never reach valid outputs).
    xpad = jnp.pad(x_nhwc.astype(jnp.bfloat16),
                   ((0, 0), (padding, padding + Hp % 2),
                    (padding, padding + Wp % 2), (0, 0)))
    Hh, Wh = (Hp + Hp % 2) // 2, (Wp + Wp % 2) // 2          # == Ho + 1, Wo + 1

    # Phase split: ph[a][b][n, r, w, :] == xpad[n, 2r + a, 2w + b, :]
    xr = xpad.reshape(N, Hh, 2, Wh, 2, Cin)
    ph = [[xr[:, :, a, :, b, :] for b in range(2)] for a in range(2)]

    tn = _pick_cout_tile(Cin, Cout)
    nj = Cout // tn
    th = _pick_conv_row_tile(Ho, Wh, Cin, tn, x_nhwc.dtype.itemsize)
    if N * nj == 1 and th >= Ho and Ho >= 2:
        th = -(-Ho // 2)                                     # >= 2 grid steps (megacore)
    nt = -(-Ho // th)

    # Row-tiled, halo-expanded, flattened phases: even-row phases get th+2 rows per
    # tile, odd-row phases th+1 (clamped / extra rows only ever feed the junk column
    # or out-of-range output rows, both dropped below).
    base = jnp.arange(nt, dtype=jnp.int32) * th
    idx0 = jnp.clip(base[:, None] + jnp.arange(th + 2, dtype=jnp.int32)[None, :], 0, Hh - 1)
    idx1 = jnp.clip(base[:, None] + jnp.arange(th + 1, dtype=jnp.int32)[None, :], 0, Hh - 1)

    def _tiles(p, idx, rows):
        g = jnp.take(p, idx.reshape(-1), axis=1)             # (N, nt*rows, Wh, Cin)
        return g.reshape(N, nt, rows * Wh, Cin)

    p00 = _tiles(ph[0][0], idx0, th + 2)
    p01 = _tiles(ph[0][1], idx0, th + 2)
    p10 = _tiles(ph[1][0], idx1, th + 1)
    p11 = _tiles(ph[1][1], idx1, th + 1)

    w_bf16 = w_hwio.astype(jnp.bfloat16)
    b2d = bias.astype(jnp.float32).reshape(1, Cout)

    spec0 = pl.BlockSpec((1, 1, (th + 2) * Wh, Cin), lambda n, t, j: (n, t, 0, 0))
    spec1 = pl.BlockSpec((1, 1, (th + 1) * Wh, Cin), lambda n, t, j: (n, t, 0, 0))

    out_flat = pl.pallas_call(
        functools.partial(_conv_down_kernel, wh=Wh),
        out_shape=jax.ShapeDtypeStruct((N, nt, th * Wh, Cout), x_nhwc.dtype),
        grid_spec=pltpu.PrefetchScalarGridSpec(
            num_scalar_prefetch=0,
            grid=(N, nt, nj),        # j innermost: phase block DMAs elided across Cout tiles
            in_specs=[spec0, spec0, spec1, spec1,
                      pl.BlockSpec((3, 3, Cin, tn), lambda n, t, j: (0, 0, 0, j)),
                      pl.BlockSpec((1, tn), lambda n, t, j: (0, j))],
            out_specs=pl.BlockSpec((1, 1, th * Wh, tn), lambda n, t, j: (n, t, 0, j)),
            scratch_shapes=[pltpu.VMEM((th * Wh, tn), jnp.float32)],
        ),
        compiler_params=pltpu.CompilerParams(
            dimension_semantics=("parallel", "parallel", "parallel"),
            vmem_limit_bytes=32 * 1024 * 1024),
    )(p00, p01, p10, p11, w_bf16, b2d)

    # Drop the junk column / padded rows and restore (N, Ho, Wo, Cout).
    return out_flat.reshape(N, nt * th, Wh, Cout)[:, :Ho, :Wo, :]


def downsample_pool_pallas(x_nhwc):
    """2x2 average pool, stride 2 (floor semantics), NHWC; reads x directly."""
    N, H, W, C = x_nhwc.shape
    Ho, Wo = H // 2, W // 2
    assert Ho >= 1 and Wo >= 1
    xe = x_nhwc[:, :2 * Ho, :2 * Wo, :] if (H % 2 or W % 2) else x_nhwc
    # Free view: xv[n, i, a, j, b*C + c] == x[n, 2i + a, 2j + b, c]
    xv = xe.reshape(N, Ho, 2, Wo, 2 * C)

    th = _pick_pool_row_tile(Ho, Wo, C, x_nhwc.dtype.itemsize)
    if N == 1 and th >= Ho and Ho >= 2:
        th = -(-Ho // 2)                                     # >= 2 grid steps at N=1
    nt = -(-Ho // th)

    return pl.pallas_call(
        _pool_down_kernel,
        out_shape=jax.ShapeDtypeStruct((N, Ho, Wo, C), x_nhwc.dtype),
        grid_spec=pltpu.PrefetchScalarGridSpec(
            num_scalar_prefetch=0,
            grid=(N, nt),
            in_specs=[pl.BlockSpec((1, th, 2, Wo, 2 * C), lambda n, t: (n, t, 0, 0, 0))],
            out_specs=pl.BlockSpec((1, th, Wo, C), lambda n, t: (n, t, 0, 0)),
        ),
        compiler_params=pltpu.CompilerParams(
            dimension_semantics=("parallel", "parallel")),
    )(xv)


# ----------------------------- module-level API -----------------------------

def init_downsample_params(key, channels, use_conv, out_channels=None):
    """Matches torch.nn.Conv2d(channels, out_channels, 3) default init (shapes/ranges)."""
    out_channels = out_channels or channels
    if not use_conv:
        assert channels == out_channels
        return {}
    fan_in = channels * 9
    bound = 1.0 / (fan_in ** 0.5)
    k1, k2 = jax.random.split(key)
    w_oihw = jax.random.uniform(k1, (out_channels, channels, 3, 3), jnp.float32, -bound, bound)
    b = jax.random.uniform(k2, (out_channels,), jnp.float32, -bound, bound)
    return {'w': jnp.transpose(w_oihw, (2, 3, 1, 0)),   # OIHW -> HWIO
            'b': b}


def downsample_forward(params, x_nchw, channels, use_conv, dims=2,
                       out_channels=None, padding=1):
    """Downsample.forward(x) for dims=2 (NCHW in / NCHW out)."""
    # TODO(synk): dims=1 (Conv1d/AvgPool1d) and dims=3 (stride (1,2,2)) paths not implemented.
    assert dims == 2
    assert x_nchw.shape[1] == channels
    x = jnp.transpose(x_nchw, (0, 2, 3, 1))            # NCHW -> NHWC (channels on lanes)
    if use_conv:
        y = downsample_conv_pallas(x, params['w'], params['b'], padding)
    else:
        y = downsample_pool_pallas(x)
    return jnp.transpose(y, (0, 3, 1, 2))              # NHWC -> NCHW


# ----------------------------- self-test -----------------------------

if __name__ == "__main__":
    key = jax.random.PRNGKey(0)
    kx, kp, kx2 = jax.random.split(key, 3)

    def conv_ref(x_nchw, params):
        x_nhwc = jnp.transpose(x_nchw, (0, 2, 3, 1))
        y = jax.lax.conv_general_dilated(
            x_nhwc, params['w'], window_strides=(2, 2), padding=((1, 1), (1, 1)),
            dimension_numbers=('NHWC', 'HWIO', 'NHWC')) + params['b'][None, None, None, :]
        return jnp.transpose(y, (0, 3, 1, 2))

    def pool_ref(x_nchw):
        x_nhwc = jnp.transpose(x_nchw, (0, 2, 3, 1))
        y = jax.lax.reduce_window(x_nhwc, 0.0, jax.lax.add,
                                  (1, 2, 2, 1), (1, 2, 2, 1), 'VALID') * 0.25
        return jnp.transpose(y, (0, 3, 1, 2))

    # ---- even spatial size: N=2, C=4, H=W=16, Cout=8 ----
    N, C, H, W, Cout = 2, 4, 16, 16, 8
    x = jax.random.normal(kx, (N, C, H, W), jnp.float32)       # NCHW like PyTorch
    params = init_downsample_params(kp, C, use_conv=True, out_channels=Cout)

    y = jax.block_until_ready(
        downsample_forward(params, x, channels=C, use_conv=True, out_channels=Cout))
    assert y.shape == (N, Cout, H // 2, W // 2)
    y_ref = conv_ref(x, params)
    # bf16 MXU operands -> small drift vs the f32 reference.
    assert jnp.allclose(y, y_ref, atol=3e-2, rtol=3e-2), \
        f"conv max_err={float(jnp.max(jnp.abs(y - y_ref)))}"

    y2 = jax.block_until_ready(downsample_forward({}, x, channels=C, use_conv=False))
    assert y2.shape == (N, C, H // 2, W // 2)
    p_ref = pool_ref(x)
    assert jnp.allclose(y2, p_ref, atol=1e-5, rtol=1e-5), \
        f"pool max_err={float(jnp.max(jnp.abs(y2 - p_ref)))}"

    # ---- odd spatial size (floor semantics), N=1 exercises row tiling + halo clamp ----
    N2, H2, W2 = 1, 9, 9
    xo = jax.random.normal(kx2, (N2, C, H2, W2), jnp.float32)

    yo = jax.block_until_ready(
        downsample_forward(params, xo, channels=C, use_conv=True, out_channels=Cout))
    assert yo.shape == (N2, Cout, 5, 5)
    yo_ref = conv_ref(xo, params)
    assert jnp.allclose(yo, yo_ref, atol=3e-2, rtol=3e-2), \
        f"odd conv max_err={float(jnp.max(jnp.abs(yo - yo_ref)))}"

    zo = jax.block_until_ready(downsample_forward({}, xo, channels=C, use_conv=False))
    assert zo.shape == (N2, C, 4, 4)
    zo_ref = pool_ref(xo)
    assert jnp.allclose(zo, zo_ref, atol=1e-5, rtol=1e-5), \
        f"odd pool max_err={float(jnp.max(jnp.abs(zo - zo_ref)))}"

    print("KERNEL_OK")
</pallas_src>

<mosaic_0001>
module attributes {stable_mosaic.version = 11 : i64} {
  func.func @_conv_down_kernel(%arg0: i32, %arg1: i32, %arg2: i32, %arg3: memref<1x1x90x4xbf16, #tpu.memory_space<vmem>>, %arg4: memref<1x1x90x4xbf16, #tpu.memory_space<vmem>>, %arg5: memref<1x1x81x4xbf16, #tpu.memory_space<vmem>>, %arg6: memref<1x1x81x4xbf16, #tpu.memory_space<vmem>>, %arg7: memref<3x3x4x8xbf16, #tpu.memory_space<vmem>>, %arg8: memref<1x8xf32, #tpu.memory_space<vmem>>, %arg9: memref<1x1x72x8xf32, #tpu.memory_space<vmem>>, %arg10: memref<72x8xf32, #tpu.memory_space<vmem>>) attributes {dimension_semantics = [#tpu.dimension_semantics<parallel>, #tpu.dimension_semantics<parallel>, #tpu.dimension_semantics<parallel>], iteration_bounds = array<i64: 2, 1, 1>, scalar_prefetch = 0 : i64, scratch_operands = 1 : i64, tpu.core_type = #tpu.core_type<tc>, window_params = [{transform_indices = @transform_0, window_bounds = array<i64: 1, 1, 90, 4>}, {transform_indices = @transform_1, window_bounds = array<i64: 1, 1, 90, 4>}, {transform_indices = @transform_2, window_bounds = array<i64: 1, 1, 81, 4>}, {transform_indices = @transform_3, window_bounds = array<i64: 1, 1, 81, 4>}, {transform_indices = @transform_4, window_bounds = array<i64: 3, 3, 4, 8>}, {transform_indices = @transform_5, window_bounds = array<i64: 1, 8>}, {transform_indices = @transform_6, window_bounds = array<i64: 1, 1, 72, 8>}]} {
    %c0 = arith.constant 0 : index
    %c0_0 = arith.constant 0 : index
    %c0_1 = arith.constant 0 : index
    %c0_2 = arith.constant 0 : index
    %0 = vector.load %arg3[%c0, %c0_0, %c0_1, %c0_2] : memref<1x1x90x4xbf16, #tpu.memory_space<vmem>>, vector<1x1x72x4xbf16>
    %1 = vector.shape_cast %0 : vector<1x1x72x4xbf16> to vector<72x4xbf16>
    %c0_3 = arith.constant 0 : index
    %c0_4 = arith.constant 0 : index
    %c0_5 = arith.constant 0 : index
    %c0_6 = arith.constant 0 : index
    %2 = vector.load %arg7[%c0_3, %c0_4, %c0_5, %c0_6] : memref<3x3x4x8xbf16, #tpu.memory_space<vmem>>, vector<1x1x4x8xbf16>
    %3 = vector.shape_cast %2 : vector<1x1x4x8xbf16> to vector<4x8xbf16>
    %cst = arith.constant dense<0.000000e+00> : vector<72x8xf32>
    %4 = tpu.matmul %1, %3, %cst {dimension_numbers = #tpu.dot_dimension_numbers<[1], [0], [0], [1], [0, 0, 1, 1], [], []>} : vector<72x4xbf16>, vector<4x8xbf16>, vector<72x8xf32> -> vector<72x8xf32>
    %c0_7 = arith.constant 0 : index
    %c0_8 = arith.constant 0 : index
    %5 = vector.load %arg10[%c0_7, %c0_8] : memref<72x8xf32, #tpu.memory_space<vmem>>, vector<72x8xf32>
    tpu.vector_store %arg10[%c0_7, %c0_8], %4 {strides = array<i32>} : memref<72x8xf32, #tpu.memory_space<vmem>>, vector<72x8xf32>,
    %c0_9 = arith.constant 0 : index
    %c0_10 = arith.constant 0 : index
    %c0_11 = arith.constant 0 : index
    %c0_12 = arith.constant 0 : index
    %6 = vector.load %arg4[%c0_9, %c0_10, %c0_11, %c0_12] : memref<1x1x90x4xbf16, #tpu.memory_space<vmem>>, vector<1x1x72x4xbf16>
    %7 = vector.shape_cast %6 : vector<1x1x72x4xbf16> to vector<72x4xbf16>
    %c0_13 = arith.constant 0 : index
    %c1 = arith.constant 1 : index
    %c0_14 = arith.constant 0 : index
    %c0_15 = arith.constant 0 : index
    %8 = vector.load %arg7[%c0_13, %c1, %c0_14, %c0_15] : memref<3x3x4x8xbf16, #tpu.memory_space<vmem>>, vector<1x1x4x8xbf16>
    %9 = vector.shape_cast %8 : vector<1x1x4x8xbf16> to vector<4x8xbf16>
    %cst_16 = arith.constant dense<0.000000e+00> : vector<72x8xf32>
    %10 = tpu.matmul %7, %9, %cst_16 {dimension_numbers = #tpu.dot_dimension_numbers<[1], [0], [0], [1], [0, 0, 1, 1], [], []>} : vector<72x4xbf16>, vector<4x8xbf16>, vector<72x8xf32> -> vector<72x8xf32>
    %c0_17 = arith.constant 0 : index
    %c0_18 = arith.constant 0 : index
    %11 = vector.load %arg10[%c0_17, %c0_18] : memref<72x8xf32, #tpu.memory_space<vmem>>, vector<72x8xf32>
    %12 = arith.addf %11, %10 : vector<72x8xf32>
    %c0_19 = arith.constant 0 : index
    %c0_20 = arith.constant 0 : index
    %13 = vector.load %arg10[%c0_19, %c0_20] : memref<72x8xf32, #tpu.memory_space<vmem>>, vector<72x8xf32>
    tpu.vector_store %arg10[%c0_19, %c0_20], %12 {strides = array<i32>} : memref<72x8xf32, #tpu.memory_space<vmem>>, vector<72x8xf32>,
    %c0_21 = arith.constant 0 : index
    %c0_22 = arith.constant 0 : index
    %c1_23 = arith.constant 1 : index
    %c0_24 = arith.constant 0 : index
    %14 = vector.load %arg3[%c0_21, %c0_22, %c1_23, %c0_24] : memref<1x1x90x4xbf16, #tpu.memory_space<vmem>>, vector<1x1x72x4xbf16>
    %15 = vector.shape_cast %14 : vector<1x1x72x4xbf16> to vector<72x4xbf16>
    %c0_25 = arith.constant 0 : index
    %c2 = arith.constant 2 : index
    %c0_26 = arith.constant 0 : index
    %c0_27 = arith.constant 0 : index
    %16 = vector.load %arg7[%c0_25, %c2, %c0_26, %c0_27] : memref<3x3x4x8xbf16, #tpu.memory_space<vmem>>, vector<1x1x4x8xbf16>
    %17 = vector.shape_cast %16 : vector<1x1x4x8xbf16> to vector<4x8xbf16>
    %cst_28 = arith.constant dense<0.000000e+00> : vector<72x8xf32>
    %18 = tpu.matmul %15, %17, %cst_28 {dimension_numbers = #tpu.dot_dimension_numbers<[1], [0], [0], [1], [0, 0, 1, 1], [], []>} : vector<72x4xbf16>, vector<4x8xbf16>, vector<72x8xf32> -> vector<72x8xf32>
    %c0_29 = arith.constant 0 : index
    %c0_30 = arith.constant 0 : index
    %19 = vector.load %arg10[%c0_29, %c0_30] : memref<72x8xf32, #tpu.memory_space<vmem>>, vector<72x8xf32>
    %20 = arith.addf %19, %18 : vector<72x8xf32>
    %c0_31 = arith.constant 0 : index
    %c0_32 = arith.constant 0 : index
    %21 = vector.load %arg10[%c0_31, %c0_32] : memref<72x8xf32, #tpu.memory_space<vmem>>, vector<72x8xf32>
    tpu.vector_store %arg10[%c0_31, %c0_32], %20 {strides = array<i32>} : memref<72x8xf32, #tpu.memory_space<vmem>>, vector<72x8xf32>,
    %c0_33 = arith.constant 0 : index
    %c0_34 = arith.constant 0 : index
    %c0_35 = arith.constant 0 : index
    %c0_36 = arith.constant 0 : index
    %22 = vector.load %arg5[%c0_33, %c0_34, %c0_35, %c0_36] : memref<1x1x81x4xbf16, #tpu.memory_space<vmem>>, vector<1x1x72x4xbf16>
    %23 = vector.shape_cast %22 : vector<1x1x72x4xbf16> to vector<72x4xbf16>
    %c1_37 = arith.constant 1 : index
    %c0_38 = arith.constant 0 : index
    %c0_39 = arith.constant 0 : index
    %c0_40 = arith.constant 0 : index
    %24 = vector.load %arg7[%c1_37, %c0_38, %c0_39, %c0_40] : memref<3x3x4x8xbf16, #tpu.memory_space<vmem>>, vector<1x1x4x8xbf16>
    %25 = vector.shape_cast %24 : vector<1x1x4x8xbf16> to vector<4x8xbf16>
    %cst_41 = arith.constant dense<0.000000e+00> : vector<72x8xf32>
    %26 = tpu.matmul %23, %25, %cst_41 {dimension_numbers = #tpu.dot_dimension_numbers<[1], [0], [0], [1], [0, 0, 1, 1], [], []>} : vector<72x4xbf16>, vector<4x8xbf16>, vector<72x8xf32> -> vector<72x8xf32>
    %c0_42 = arith.constant 0 : index
    %c0_43 = arith.constant 0 : index
    %27 = vector.load %arg10[%c0_42, %c0_43] : memref<72x8xf32, #tpu.memory_space<vmem>>, vector<72x8xf32>
    %28 = arith.addf %27, %26 : vector<72x8xf32>
    %c0_44 = arith.constant 0 : index
    %c0_45 = arith.constant 0 : index
    %29 = vector.load %arg10[%c0_44, %c0_45] : memref<72x8xf32, #tpu.memory_space<vmem>>, vector<72x8xf32>
    tpu.vector_store %arg10[%c0_44, %c0_45], %28 {strides = array<i32>} : memref<72x8xf32, #tpu.memory_space<vmem>>, vector<72x8xf32>,
    %c0_46 = arith.constant 0 : index
    %c0_47 = arith.constant 0 : index
    %c0_48 = arith.constant 0 : index
    %c0_49 = arith.constant 0 : index
    %30 = vector.load %arg6[%c0_46, %c0_47, %c0_48, %c0_49] : memref<1x1x81x4xbf16, #tpu.memory_space<vmem>>, vector<1x1x72x4xbf16>
    %31 = vector.shape_cast %30 : vector<1x1x72x4xbf16> to vector<72x4xbf16>
    %c1_50 = arith.constant 1 : index
    %c1_51 = arith.constant 1 : index
    %c0_52 = arith.constant 0 : index
    %c0_53 = arith.constant 0 : index
    %32 = vector.load %arg7[%c1_50, %c1_51, %c0_52, %c0_53] : memref<3x3x4x8xbf16, #tpu.memory_space<vmem>>, vector<1x1x4x8xbf16>
    %33 = vector.shape_cast %32 : vector<1x1x4x8xbf16> to vector<4x8xbf16>
    %cst_54 = arith.constant dense<0.000000e+00> : vector<72x8xf32>
    %34 = tpu.matmul %31, %33, %cst_54 {dimension_numbers = #tpu.dot_dimension_numbers<[1], [0], [0], [1], [0, 0, 1, 1], [], []>} : vector<72x4xbf16>, vector<4x8xbf16>, vector<72x8xf32> -> vector<72x8xf32>
    %c0_55 = arith.constant 0 : index
    %c0_56 = arith.constant 0 : index
    %35 = vector.load %arg10[%c0_55, %c0_56] : memref<72x8xf32, #tpu.memory_space<vmem>>, vector<72x8xf32>
    %36 = arith.addf %35, %34 : vector<72x8xf32>
    %c0_57 = arith.constant 0 : index
    %c0_58 = arith.constant 0 : index
    %37 = vector.load %arg10[%c0_57, %c0_58] : memref<72x8xf32, #tpu.memory_space<vmem>>, vector<72x8xf32>
    tpu.vector_store %arg10[%c0_57, %c0_58], %36 {strides = array<i32>} : memref<72x8xf32, #tpu.memory_space<vmem>>, vector<72x8xf32>,
    %c0_59 = arith.constant 0 : index
    %c0_60 = arith.constant 0 : index
    %c1_61 = arith.constant 1 : index
    %c0_62 = arith.constant 0 : index
    %38 = vector.load %arg5[%c0_59, %c0_60, %c1_61, %c0_62] : memref<1x1x81x4xbf16, #tpu.memory_space<vmem>>, vector<1x1x72x4xbf16>
    %39 = vector.shape_cast %38 : vector<1x1x72x4xbf16> to vector<72x4xbf16>
    %c1_63 = arith.constant 1 : index
    %c2_64 = arith.constant 2 : index
    %c0_65 = arith.constant 0 : index
    %c0_66 = arith.constant 0 : index
    %40 = vector.load %arg7[%c1_63, %c2_64, %c0_65, %c0_66] : memref<3x3x4x8xbf16, #tpu.memory_space<vmem>>, vector<1x1x4x8xbf16>
    %41 = vector.shape_cast %40 : vector<1x1x4x8xbf16> to vector<4x8xbf16>
    %cst_67 = arith.constant dense<0.000000e+00> : vector<72x8xf32>
    %42 = tpu.matmul %39, %41, %cst_67 {dimension_numbers = #tpu.dot_dimension_numbers<[1], [0], [0], [1], [0, 0, 1, 1], [], []>} : vector<72x4xbf16>, vector<4x8xbf16>, vector<72x8xf32> -> vector<72x8xf32>
    %c0_68 = arith.constant 0 : index
    %c0_69 = arith.constant 0 : index
    %43 = vector.load %arg10[%c0_68, %c0_69] : memref<72x8xf32, #tpu.memory_space<vmem>>, vector<72x8xf32>
    %44 = arith.addf %43, %42 : vector<72x8xf32>
    %c0_70 = arith.constant 0 : index
    %c0_71 = arith.constant 0 : index
    %45 = vector.load %arg10[%c0_70, %c0_71] : memref<72x8xf32, #tpu.memory_space<vmem>>, vector<72x8xf32>
    tpu.vector_store %arg10[%c0_70, %c0_71], %44 {strides = array<i32>} : memref<72x8xf32, #tpu.memory_space<vmem>>, vector<72x8xf32>,
    %c0_72 = arith.constant 0 : index
    %c0_73 = arith.constant 0 : index
    %c9 = arith.constant 9 : index
    %c0_74 = arith.constant 0 : index
    %46 = vector.load %arg3[%c0_72, %c0_73, %c9, %c0_74] : memref<1x1x90x4xbf16, #tpu.memory_space<vmem>>, vector<1x1x72x4xbf16>
    %47 = vector.shape_cast %46 : vector<1x1x72x4xbf16> to vector<72x4xbf16>
    %c2_75 = arith.constant 2 : index
    %c0_76 = arith.constant 0 : index
    %c0_77 = arith.constant 0 : index
    %c0_78 = arith.constant 0 : index
    %48 = vector.load %arg7[%c2_75, %c0_76, %c0_77, %c0_78] : memref<3x3x4x8xbf16, #tpu.memory_space<vmem>>, vector<1x1x4x8xbf16>
    %49 = vector.shape_cast %48 : vector<1x1x4x8xbf16> to vector<4x8xbf16>
    %cst_79 = arith.constant dense<0.000000e+00> : vector<72x8xf32>
    %50 = tpu.matmul %47, %49, %cst_79 {dimension_numbers = #tpu.dot_dimension_numbers<[1], [0], [0], [1], [0, 0, 1, 1], [], []>} : vector<72x4xbf16>, vector<4x8xbf16>, vector<72x8xf32> -> vector<72x8xf32>
    %c0_80 = arith.constant 0 : index
    %c0_81 = arith.constant 0 : index
    %51 = vector.load %arg10[%c0_80, %c0_81] : memref<72x8xf32, #tpu.memory_space<vmem>>, vector<72x8xf32>
    %52 = arith.addf %51, %50 : vector<72x8xf32>
    %c0_82 = arith.constant 0 : index
    %c0_83 = arith.constant 0 : index
    %53 = vector.load %arg10[%c0_82, %c0_83] : memref<72x8xf32, #tpu.memory_space<vmem>>, vector<72x8xf32>
    tpu.vector_store %arg10[%c0_82, %c0_83], %52 {strides = array<i32>} : memref<72x8xf32, #tpu.memory_space<vmem>>, vector<72x8xf32>,
    %c0_84 = arith.constant 0 : index
    %c0_85 = arith.constant 0 : index
    %c9_86 = arith.constant 9 : index
    %c0_87 = arith.constant 0 : index
    %54 = vector.load %arg4[%c0_84, %c0_85, %c9_86, %c0_87] : memref<1x1x90x4xbf16, #tpu.memory_space<vmem>>, vector<1x1x72x4xbf16>
    %55 = vector.shape_cast %54 : vector<1x1x72x4xbf16> to vector<72x4xbf16>
    %c2_88 = arith.constant 2 : index
    %c1_89 = arith.constant 1 : index
    %c0_90 = arith.constant 0 : index
    %c0_91 = arith.constant 0 : index
    %56 = vector.load %arg7[%c2_88, %c1_89, %c0_90, %c0_91] : memref<3x3x4x8xbf16, #tpu.memory_space<vmem>>, vector<1x1x4x8xbf16>
    %57 = vector.shape_cast %56 : vector<1x1x4x8xbf16> to vector<4x8xbf16>
    %cst_92 = arith.constant dense<0.000000e+00> : vector<72x8xf32>
    %58 = tpu.matmul %55, %57, %cst_92 {dimension_numbers = #tpu.dot_dimension_numbers<[1], [0], [0], [1], [0, 0, 1, 1], [], []>} : vector<72x4xbf16>, vector<4x8xbf16>, vector<72x8xf32> -> vector<72x8xf32>
    %c0_93 = arith.constant 0 : index
    %c0_94 = arith.constant 0 : index
    %59 = vector.load %arg10[%c0_93, %c0_94] : memref<72x8xf32, #tpu.memory_space<vmem>>, vector<72x8xf32>
    %60 = arith.addf %59, %58 : vector<72x8xf32>
    %c0_95 = arith.constant 0 : index
    %c0_96 = arith.constant 0 : index
    %61 = vector.load %arg10[%c0_95, %c0_96] : memref<72x8xf32, #tpu.memory_space<vmem>>, vector<72x8xf32>
    tpu.vector_store %arg10[%c0_95, %c0_96], %60 {strides = array<i32>} : memref<72x8xf32, #tpu.memory_space<vmem>>, vector<72x8xf32>,
    %c0_97 = arith.constant 0 : index
    %c0_98 = arith.constant 0 : index
    %c10 = arith.constant 10 : index
    %c0_99 = arith.constant 0 : index
    %62 = vector.load %arg3[%c0_97, %c0_98, %c10, %c0_99] : memref<1x1x90x4xbf16, #tpu.memory_space<vmem>>, vector<1x1x72x4xbf16>
    %63 = vector.shape_cast %62 : vector<1x1x72x4xbf16> to vector<72x4xbf16>
    %c2_100 = arith.constant 2 : index
    %c2_101 = arith.constant 2 : index
    %c0_102 = arith.constant 0 : index
    %c0_103 = arith.constant 0 : index
    %64 = vector.load %arg7[%c2_100, %c2_101, %c0_102, %c0_103] : memref<3x3x4x8xbf16, #tpu.memory_space<vmem>>, vector<1x1x4x8xbf16>
    %65 = vector.shape_cast %64 : vector<1x1x4x8xbf16> to vector<4x8xbf16>
    %cst_104 = arith.constant dense<0.000000e+00> : vector<72x8xf32>
    %66 = tpu.matmul %63, %65, %cst_104 {dimension_numbers = #tpu.dot_dimension_numbers<[1], [0], [0], [1], [0, 0, 1, 1], [], []>} : vector<72x4xbf16>, vector<4x8xbf16>, vector<72x8xf32> -> vector<72x8xf32>
    %c0_105 = arith.constant 0 : index
    %c0_106 = arith.constant 0 : index
    %67 = vector.load %arg10[%c0_105, %c0_106] : memref<72x8xf32, #tpu.memory_space<vmem>>, vector<72x8xf32>
    %68 = arith.addf %67, %66 : vector<72x8xf32>
    %c0_107 = arith.constant 0 : index
    %c0_108 = arith.constant 0 : index
    %69 = vector.load %arg10[%c0_107, %c0_108] : memref<72x8xf32, #tpu.memory_space<vmem>>, vector<72x8xf32>
    tpu.vector_store %arg10[%c0_107, %c0_108], %68 {strides = array<i32>} : memref<72x8xf32, #tpu.memory_space<vmem>>, vector<72x8xf32>,
    %c0_109 = arith.constant 0 : index
    %c0_110 = arith.constant 0 : index
    %70 = vector.load %arg10[%c0_109, %c0_110] : memref<72x8xf32, #tpu.memory_space<vmem>>, vector<72x8xf32>
    %c0_111 = arith.constant 0 : index
    %c0_112 = arith.constant 0 : index
    %71 = vector.load %arg8[%c0_111, %c0_112] : memref<1x8xf32, #tpu.memory_space<vmem>>, vector<1x8xf32>
    %72 = vector.broadcast %71 : vector<1x8xf32> to vector<72x8xf32>
    %73 = arith.addf %70, %72 : vector<72x8xf32>
    %c0_113 = arith.constant 0 : index
    %c0_114 = arith.constant 0 : index
    %c0_115 = arith.constant 0 : index
    %c0_116 = arith.constant 0 : index
    %74 = vector.load %arg9[%c0_113, %c0_114, %c0_115, %c0_116] : memref<1x1x72x8xf32, #tpu.memory_space<vmem>>, vector<1x1x72x8xf32>
    %75 = vector.shape_cast %74 : vector<1x1x72x8xf32> to vector<72x8xf32>
    %76 = vector.shape_cast %73 : vector<72x8xf32> to vector<1x1x72x8xf32>
    tpu.vector_store %arg9[%c0_113, %c0_114, %c0_115, %c0_116], %76 {strides = array<i32>} : memref<1x1x72x8xf32, #tpu.memory_space<vmem>>, vector<1x1x72x8xf32>,
    return
  }
  func.func @transform_0(%arg0: i32, %arg1: i32, %arg2: i32) -> (i32, i32, i32, i32) {
    %c0_i32 = arith.constant 0 : i32
    %c0_i32_0 = arith.constant 0 : i32
    %c0_i32_1 = arith.constant 0 : i32
    return %arg0, %arg1, %c0_i32, %c0_i32_0 : i32, i32, i32, i32
  }
  func.func @transform_1(%arg0: i32, %arg1: i32, %arg2: i32) -> (i32, i32, i32, i32) {
    %c0_i32 = arith.constant 0 : i32
    %c0_i32_0 = arith.constant 0 : i32
    %c0_i32_1 = arith.constant 0 : i32
    return %arg0, %arg1, %c0_i32, %c0_i32_0 : i32, i32, i32, i32
  }
  func.func @transform_2(%arg0: i32, %arg1: i32, %arg2: i32) -> (i32, i32, i32, i32) {
    %c0_i32 = arith.constant 0 : i32
    %c0_i32_0 = arith.constant 0 : i32
    %c0_i32_1 = arith.constant 0 : i32
    return %arg0, %arg1, %c0_i32, %c0_i32_0 : i32, i32, i32, i32
  }
  func.func @transform_3(%arg0: i32, %arg1: i32, %arg2: i32) -> (i32, i32, i32, i32) {
    %c0_i32 = arith.constant 0 : i32
    %c0_i32_0 = arith.constant 0 : i32
    %c0_i32_1 = arith.constant 0 : i32
    return %arg0, %arg1, %c0_i32, %c0_i32_0 : i32, i32, i32, i32
  }
  func.func @transform_4(%arg0: i32, %arg1: i32, %arg2: i32) -> (i32, i32, i32, i32) {
    %c0_i32 = arith.constant 0 : i32
    %c0_i32_0 = arith.constant 0 : i32
    %c0_i32_1 = arith.constant 0 : i32
    %c0_i32_2 = arith.constant 0 : i32
    return %c0_i32, %c0_i32_0, %c0_i32_1, %arg2 : i32, i32, i32, i32
  }
  func.func @transform_5(%arg0: i32, %arg1: i32, %arg2: i32) -> (i32, i32) {
    %c0_i32 = arith.constant 0 : i32
    %c0_i32_0 = arith.constant 0 : i32
    return %c0_i32, %arg2 : i32, i32
  }
  func.func @transform_6(%arg0: i32, %arg1: i32, %arg2: i32) -> (i32, i32, i32, i32) {
    %c0_i32 = arith.constant 0 : i32
    %c0_i32_0 = arith.constant 0 : i32
    return %arg0, %arg1, %c0_i32, %arg2 : i32, i32, i32, i32
  }
}

</mosaic_0001>

<bundles_post_ra>
// kernel: tpu_custom_call.1
= control target key start
LH: loop header
LB: loop body
LE: loop exit
PB: predicated region body
PF: predicated region fallthrough
CT: control target
= control target key end

     0   :  { %s2694_s21 = smov 0   ;;  %s2696_s22 = smov 0   ;;  %s3186_s0 = inlined_call_operand.vmem [shape: bf16[2,1,90,4], index: 0, kind: input, shape index: {}]   ;;  %s3187_s1 = inlined_call_operand.vmem [shape: bf16[2,1,90,4], index: 1, kind: input, shape index: {}]   ;;  %s3188_s2 = inlined_call_operand.vmem [shape: bf16[2,1,81,4], index: 2, kind: input, shape index: {}]   ;;  %s3189_s3 = inlined_call_operand.vmem [shape: bf16[2,1,81,4], index: 3, kind: input, shape index: {}]   ;;  %s3190_s4 = inlined_call_operand.vmem [shape: bf16[3,3,4,8], index: 4, kind: input, shape index: {}]   ;;  %s3191_s5 = inlined_call_operand.vmem [shape: f32[1,8], index: 5, kind: input, shape index: {}]   ;;  %s3192_s6 = inlined_call_operand.vmem [shape: f32[2,1,72,8], index: 6, kind: output, shape index: {}]  }
   0x1   :  { %s2698_s23 = smov 0  }
   0x2 LB: > { %s35_s24 = sadd.s32 1, %s2651_s22  ;;  %p2198_p0 = scmp.ge.s32.totalorder %s2655_s23, 1  ;;  %s2655_s23 = sphi %s2698_s23, %s16_s23   ;;  %s2651_s22 = sphi %s2696_s22, %s3194_s22   ;;  %s2647_s21 = sphi %s2694_s21, %s3193_s21  }
   0x3   : > { %p37_p1 = scmp.ge.s32.totalorder %s35_s24, 2  ;;  %p306_p2 = scmp.lt.s32.totalorder %s2655_s23, 3 }
   0x5   : > { %s3196_s24 = smov (%p37_p1, %s35_s24), 0  ;;  %p307_p3 = pnand %p2198_p0, %p306_p2 }
   0x6   : > { %p381_p4 = scmp.lt.s32.totalorder (!%p307_p3), %s2647_s21, 1 }
   0x7   : > { %310 = sbr.rel (%p307_p3) target bundleno = 401 (0x191), region = 44 }
   0xc   : > { %v446_v0 = vld [vmem:[%s3190_s4] sm:$0x3]  ;;  %vm486_vm0 = vcmask 1041408   ;;  %v2657_v1 = vmov 0.0   ;;  %s3198_s21 = smov (!%p381_p4, %s2647_s21), 1  ;;  %vm2658_vm1 = vmmov 0  }
   0xd   : > { %2557 = vmatprep.subr.bf16.mxu1 %v2657_v1  ;;  %2359 = vmatprep.subr.bf16.mxu0 %v2657_v1  ;;  %v488_v2 = vsel %vm486_vm0, %v446_v0, 0  ;;  %s2559_s27 = smul.u32 48, %s3198_s21  ;;  %v2225_v3 = vld [vmem:[%s3190_s4 + $0x4] sm:$0x3]  ;;  %v2214_v4 = vld [vmem:[%s3190_s4 + $0x2] sm:$0x3] }
   0xe   : > { %2558 = vmatpush3.bf16.msra.mxu1 %v488_v2  ;;  %2360 = vmatpush3.bf16.msra.mxu0 %v488_v2  ;;  %vm470_vm2 = vcmask 31744   ;;  %v816_v6 = vsel %vm486_vm0, %v2225_v3, 0  ;;  %v622_v8 = vsel %vm486_vm0, %v2214_v4, 0  ;;  %s2560_s14 = smul.u32 44, %s3198_s21  ;;  %v2236_v14 = vld [vmem:[%s3190_s4 + $0x6] sm:$0x3] }
   0xf   : > { %2361 = vmatprep.mubr.msk.bf16.mxu0 %vm2658_vm1, %v2657_v1  ;;  %2373 = vmatprep.mubr.msk.bf16.mxu1 %vm2658_vm1, %v2657_v1  ;;  %s2736_s10 = scalar_lea.vmem %s3186_s0, %s2559_s27  ;;  %s2747_s13 = scalar_lea.vmem %s3187_s1, %s2559_s27  ;;  %vm760_vm3 = vsmask.f32 7424  ;;  %v967_v21 = vsel %vm486_vm0, %v2236_v14, 0  ;;  %v2247_v25 = vld [vmem:[%s3190_s4 + $0x8] sm:$0x3]  ;;  %vm1835_vm4 = vcmask 1046528  }
  0x10   : > { %2381 = vmatprep.subr.bf16.mxu1 %v2657_v1  ;;  %2403 = vmatprep.subr.bf16.mxu0 %v2657_v1  ;;  %v2588_v5 = vld [vmem:[%s2736_s10] sm:$0xff]   ;;  %v2589_v7 = vld [vmem:[%s2736_s10 + $0x18] sm:$0xff]   ;;  %v2590_v9 = vld [vmem:[%s2736_s10 + $0x8] sm:$0xff]   ;;  %s2774_s19 = scalar_lea.vmem %s3188_s2, %s2560_s14  ;;  %s2784_s26 = scalar_lea.vmem %s3189_s3, %s2560_s14  ;;  %v1118_v32 = vsel %vm486_vm0, %v2247_v25, 0  ;;  %vm562_vm5 = vcmask 64512  }
  0x11   : > { %2362 = vmatmul.mubr.msk.bf16.vlgmr.msra.gmra.mxu0 %vm470_vm2, %v2588_v5  ;;  %2374 = vmatmul.mubr.msk.bf16.vlgmr.msra.gmra.mxu1 %vm470_vm2, %v2589_v7  ;;  %v2591_v10 = vld [vmem:[%s2736_s10 + $0x20] ss:$0 sps:$4 sm:$0xff]   ;;  %v2596_v12 = vld [vmem:[%s2736_s10 + $0x8] sm:$0xff]   ;;  %v2592_v15 = vld [vmem:[%s2736_s10 + $0x10] sm:$0xff]  }
  0x12   : > { %2404 = vmatpush3.bf16.msra.mxu0 %v816_v6  ;;  %2382 = vmatpush3.bf16.msra.mxu1 %v622_v8  ;;  %v2595_v11 = vld [vmem:[%s2736_s10] sm:$0xff]   ;;  %v769_v19 = vshll.u32 %v2596_v12, 16  ;;  %v2598_v20 = vld [vmem:[%s2736_s10 + $0x10] sm:$0xff]   ;;  %v2779_v22 = vld [vmem:[%s2736_s10 + $0x18] sm:$0xff]   ;;  %v773_v28 = vshrl.u32 %v2596_v12, 16 }
  0x13   : > { %2365 = vmatprep.mubr.msk.bf16.mxu0 %vm2658_vm1, %v2657_v1  ;;  %2377 = vmatprep.mubr.msk.bf16.mxu1 %vm2658_vm1, %v2657_v1  ;;  %v764_v13 = vshll.u32 %v2595_v11, 16  ;;  %v2593_v16 = vld [vmem:[%s2747_s13] sm:$0xff]   ;;  %v762_v17 = vshrl.u32 %v2595_v11, 16  ;;  %v777_v26 = vshll.u32 %v2598_v20, 16  ;;  %v2594_v27 = vld [vmem:[%s2747_s13 + $0x8] sm:$0xff]   ;;  %v785_v29 = vshll.u32 %v2779_v22, 16 }
  0x14   : > { %2425 = vmatprep.subr.bf16.mxu1 %v2657_v1  ;;  %2447 = vmatprep.subr.bf16.mxu0 %v2657_v1  ;;  %v771_v24 = vrot.slane %v769_v19, 1  ;;  %v2800_v31 = vld [vmem:[%s2736_s10 + $0x20] sm:$0x1f]   ;;  %v781_v34 = vshrl.u32 %v2598_v20, 16  ;;  %v789_v37 = vshrl.u32 %v2779_v22, 16  ;;  %v2614_v39 = vld [vmem:[%s2774_s19 + $0x8] sm:$0xff]  }
  0x15   : > { %v766_v18 = vrot.slane %v764_v13, 1  ;;  %v779_v33 = vrot.slane %v777_v26, 1  ;;  %v2804_v36 = vrot.slane %v785_v29, 1  ;;  %v2613_v38 = vld [vmem:[%s2774_s19] sm:$0xff]   ;;  %v793_v40 = vshll.u32 %v2800_v31, 16  ;;  %v2615_v41 = vld [vmem:[%s2774_s19 + $0x10] sm:$0xff]  }
  0x16   : > { %v775_v35 = vor.u32 %v773_v28, %v771_v24  ;;  %v1257_v42 = vshrl.u32 %v2613_v38, 16  ;;  %v1259_v43 = vshll.u32 %v2613_v38, 16  ;;  %v1264_v44 = vshll.u32 %v2614_v39, 16  ;;  %v2597_v46 = vld [vmem:[%s2747_s13 + $0x10] sm:$0xff]   ;;  %v2616_v48 = vld [vmem:[%s2736_s10 + $0x4] sm:$0xff]   ;;  %v2618_v54 = vld [vmem:[%s2774_s19 + $0x18] sm:$0xff]  }
  0x17   : > { %v767_v23 = vor.u32 %v766_v18, %v762_v17  ;;  %v1268_v45 = vshrl.u32 %v2614_v39, 16  ;;  %v1272_v47 = vshll.u32 %v2615_v41, 16  ;;  %v783_v50 = vor.u32 %v781_v34, %v779_v33  ;;  %v2617_v53 = vld [vmem:[%s2736_s10 + $0xc] sm:$0xff]   ;;  %v2619_v2 = vld [vmem:[%s2736_s10 + $0x14] sm:$0xff]   ;;  %v2834_v11 = vld [vmem:[%s2774_s19 + $0x20] sm:$0x1f]  }
  0x18   : > { %v780_v49 = vsel %vm760_vm3, %v775_v35, %v779_v33  ;;  %v1261_v51 = vrot.slane %v1259_v43, 1  ;;  %v1266_v52 = vrot.slane %v1264_v44, 1  ;;  %v1450_v56 = vshrl.u32 %v2616_v48, 16  ;;  %v2621_v12 = vld [vmem:[%s2736_s10 + $0x1c] sm:$0xff]   ;;  %v2623_v17 = vld [vmem:[%s2747_s13 + $0x4] sm:$0xff]  }
  0x19   : > { %2366 = vmatmul.mubr.msk.bf16.gmra.mxu0 %vm470_vm2, %v2590_v9  ;;  %2378 = vmatmul.mubr.msk.bf16.gmra.mxu1 %vm470_vm2, %v2591_v10  ;;  %v772_v30 = vsel %vm760_vm3, %v767_v23, %v771_v24  ;;  %v1274_v55 = vrot.slane %v1272_v47, 1  ;;  %v1452_v57 = vshll.u32 %v2616_v48, 16  ;;  %v1276_v58 = vshrl.u32 %v2615_v41, 16  ;;  %v2599_v18 = vld [vmem:[%s2747_s13 + $0x18] sm:$0xff]   ;;  %v2851_v25 = vld [vmem:[%s2736_s10 + $0x24] sm:$0x1f]  }
  0x1a   : > { %2369 = vmatprep.mubr.msk.bf16.mxu0 %vm2658_vm1, %v2657_v1  ;;  %2383 = vmatprep.mubr.msk.bf16.mxu1 %vm2658_vm1, %v2657_v1  ;;  %v1262_v59 = vor.u32 %v1261_v51, %v1257_v42  ;;  %v1270_v60 = vor.u32 %v1268_v45, %v1266_v52  ;;  %v1457_v61 = vshll.u32 %v2617_v53, 16  ;;  %v1280_v62 = vshll.u32 %v2618_v54, 16  ;;  %v2625_v42 = vld [vmem:[%s2747_s13 + $0x14] sm:$0xff]  }
  0x1b   : > { %v1454_v63 = vrot.slane %v1452_v57, 1  ;;  %v1278_v0 = vor.u32 %v1276_v58, %v1274_v55  ;;  %v1461_v3 = vshrl.u32 %v2617_v53, 16  ;;  %v1284_v4 = vshrl.u32 %v2618_v54, 16  ;;  %v2628_v53 = vld [vmem:[%s2747_s13 + $0x1c] sm:$0xff]  }
  0x1c   : > { %v2825_v5 = vsel %vm760_vm3, %v1262_v59, %v1266_v52  ;;  %v2828_v6 = vsel %vm760_vm3, %v1270_v60, %v1274_v55  ;;  %v1459_v7 = vrot.slane %v1457_v61, 1  ;;  %v1282_v8 = vrot.slane %v1280_v62, 1  ;;  %v2601_v54 = vld [vmem:[%s2747_s13 + $0x20] ss:$0 sps:$4 sm:$0xff]   ;;  %v2895_v59 = vld [vmem:[%s2747_s13 + $0x24] sm:$0x1f]  }
  0x1d   : > { %v1455_v9 = vor.u32 %v1454_v63, %v1450_v56  ;;  %v1465_v10 = vshll.u32 %v2619_v2, 16  ;;  %v1473_v23 = vshll.u32 %v2621_v12, 16  ;;  %v788_v24 = vsel %vm760_vm3, %v783_v50, %v2804_v36 }
  0x1e   : > { %v2840_v13 = vsel %vm760_vm3, %v1278_v0, %v1282_v8  ;;  %v1463_v14 = vor.u32 %v1461_v3, %v1459_v7  ;;  %v1477_v26 = vshrl.u32 %v2621_v12, 16  ;;  %v1481_v33 = vshll.u32 %v2851_v25, 16  ;;  %v2605_v12 = vld [vmem:[%s2784_s26] sm:$0xff]  }
  0x1f   : > { %v2845_v19 = vsel %vm760_vm3, %v1455_v9, %v1459_v7  ;;  %v1467_v20 = vrot.slane %v1465_v10, 1  ;;  %v1643_v34 = vshrl.u32 %v2623_v17, 16  ;;  %v1645_v35 = vshll.u32 %v2623_v17, 16  ;;  %v2269_v10 = vld [vmem:[%s3190_s4 + $0xc] sm:$0x3]  ;;  %v2606_v17 = vld [vmem:[%s2774_s19 + $0x10] sm:$0xff]  }
  0x20   : > { %v2869_v43 = vrot.slane %v1481_v33, 1  ;;  %v791_v47 = vor.u32 %v789_v37, %v2804_v36  ;;  %v795_v48 = vrot.slane %v793_v40, 1  ;;  %v1662_v37 = vshrl.u32 %v2625_v42, 16 }
  0x21   : > { %2370 = vmatmul.mubr.msk.bf16.gmra.mxu0 %vm470_vm2, %v2592_v15  ;;  %2384 = vmatmul.mubr.msk.bf16.vlgmr.msra.gmra.mxu1 %vm470_vm2, %v2593_v16  ;;  %v1286_v15 = vor.u32 %v1284_v4, %v1282_v8  ;;  %v1469_v16 = vshrl.u32 %v2619_v2, 16  ;;  %v2855_v28 = vsel %vm760_vm3, %v1463_v14, %v1467_v20  ;;  %v1647_v44 = vrot.slane %v1645_v35, 1  ;;  %v2603_v8 = vld [vmem:[%s2774_s19] sm:$0xff]   ;;  %v2604_v14 = vld [vmem:[%s2774_s19 + $0x8] sm:$0xff]  }
  0x22   : > { %2405 = vmatprep.mubr.msk.bf16.mxu0 %vm2658_vm1, %v2657_v1  ;;  %2426 = vmatpush3.bf16.msra.mxu1 %v967_v21  ;;  %v1288_v21 = vshll.u32 %v2834_v11, 16  ;;  %v796_v40 = vsel %vm760_vm3, %v791_v47, %v795_v48  ;;  %v1666_v56 = vshll.u32 %v2628_v53, 16  ;;  %v1670_v60 = vshrl.u32 %v2628_v53, 16 }
  0x23   : > { %2387 = vmatprep.mubr.msk.bf16.mxu1 %vm2658_vm1, %v2657_v1  ;;  %2469 = vmatprep.subr.bf16.mxu1 %v2657_v1  ;;  %v1648_v51 = vor.u32 %v1647_v44, %v1643_v34  ;;  %v797_v62 = vshrl.u32 %v2800_v31, 16  ;;  %v1674_v63 = vshll.u32 %v2895_v59, 16  ;;  %v2258_v31 = vld [vmem:[%s3190_s4 + $0xa] sm:$0x3]  ;;  %v2629_v34 = vld [vmem:[%s2736_s10 + $0x14] sm:$0xff]   ;;  %v1678_v44 = vshrl.u32 %v2895_v59, 16 }
  0x24   : > { %v2857_v29 = vrot.slane %v1288_v21, 1  ;;  %v1668_v61 = vrot.slane %v1666_v56, 1  ;;  %v1311_v9 = vsel %vm486_vm0, %v2258_v31, 0  ;;  %v2611_v21 = vld [vmem:[%s2784_s26 + $0x18] sm:$0xff]   ;;  %v1839_v35 = vrot.slane %v2629_v34, 1 }
  0x25   : > { %v2908_v3 = vrot.slane %v1674_v63, 1  ;;  %v799_v4 = vor.u32 %v797_v62, %v795_v48 }
  0x26   : > { %v2862_v38 = vsel %vm760_vm3, %v1286_v15, %v2857_v29  ;;  %v1672_v2 = vor.u32 %v1670_v60, %v1668_v61  ;;  %v1504_v15 = vsel %vm486_vm0, %v2269_v10, 0 }
  0x28   : > { %v2915_v7 = vsel %vm760_vm3, %v1672_v2, %v2908_v3 }
  0x29   : > { %2406 = vmatmul.mubr.msk.bf16.vlgmr.msra.gmra.mxu0 %vm470_vm2, %v772_v30  ;;  %2388 = vmatmul.mubr.msk.bf16.gmra.mxu1 %vm470_vm2, %v2594_v27  ;;  %v2624_v27 = vld [vmem:[%s2747_s13 + $0xc] sm:$0xff]   ;;  %v1471_v30 = vor.u32 %v1469_v16, %v1467_v20  ;;  %v2608_v20 = vld [vmem:[%s2774_s19 + $0x18] sm:$0xff]  }
  0x2a   : > { %2448 = vmatpush3.bf16.msra.mxu0 %v1118_v32  ;;  %2391 = vmatprep.mubr.msk.bf16.mxu1 %vm2658_vm1, %v2657_v1  ;;  %v1475_v32 = vrot.slane %v1473_v23, 1  ;;  %v1650_v45 = vshll.u32 %v2624_v27, 16  ;;  %v2607_v16 = vld [vmem:[%s2784_s26 + $0x8] sm:$0xff]   ;;  %v2610_v23 = vld [vmem:[%s2774_s19 + $0x20] ss:$0 sps:$4 sm:$0xff]  }
  0x2b   : > { %2409 = vmatprep.mubr.msk.bf16.mxu0 %vm2658_vm1, %v2657_v1  ;;  %2491 = vmatprep.subr.bf16.mxu0 %v2657_v1 }
  0x2c   : > { %v2865_v39 = vsel %vm760_vm3, %v1471_v30, %v1475_v32  ;;  %v1479_v41 = vor.u32 %v1477_v26, %v1475_v32  ;;  %v1652_v52 = vrot.slane %v1650_v45, 1  ;;  %v2280_v26 = vld [vmem:[%s3190_s4 + $0xe] sm:$0x3]  ;;  %v2291_v30 = vld [vmem:[%s3190_s4 + $0x10] sm:$0x3] }
  0x2d   : > { %v1861_v32 = vsel %vm486_vm0, %v2291_v30, 0 }
  0x2e   : > { %v2883_v50 = vsel %vm760_vm3, %v1479_v41, %v2869_v43  ;;  %v2888_v22 = vsel %vm760_vm3, %v1648_v51, %v1652_v52 }
  0x31   : > { %2410 = vmatmul.mubr.msk.bf16.gmra.mxu0 %vm470_vm2, %v780_v49  ;;  %2392 = vmatmul.mubr.msk.bf16.gmra.mxu1 %vm470_vm2, %v2597_v46  ;;  %v1654_v46 = vshrl.u32 %v2624_v27, 16  ;;  %v1658_v49 = vshll.u32 %v2625_v42, 16  ;;  %v1697_v27 = vsel %vm486_vm0, %v2280_v26, 0 }
  0x32   : > { %2413 = vmatprep.mubr.msk.bf16.mxu0 %vm2658_vm1, %v2657_v1  ;;  %2395 = vmatprep.mubr.msk.bf16.mxu1 %vm2658_vm1, %v2657_v1 }
  0x33   : > { %v1660_v55 = vrot.slane %v1658_v49, 1  ;;  %v1656_v36 = vor.u32 %v1654_v46, %v1652_v52  ;;  %v1680_v46 = vor.u32 %v1678_v44, %v2908_v3 }
  0x35   : > { %v2892_v57 = vsel %vm760_vm3, %v1656_v36, %v1660_v55  ;;  %v1664_v58 = vor.u32 %v1662_v37, %v1660_v55 }
  0x37   : > { %v2904_v0 = vsel %vm760_vm3, %v1664_v58, %v1668_v61 }
  0x39   : > { %2414 = vmatmul.mubr.msk.bf16.gmra.mxu0 %vm470_vm2, %v788_v24  ;;  %2396 = vmatmul.mubr.msk.bf16.gmra.mxu1 %vm470_vm2, %v2599_v18  ;;  %v2609_v18 = vld [vmem:[%s2784_s26 + $0x10] sm:$0xff]   ;;  %v2612_v24 = vld [vmem:[%s2784_s26 + $0x20] ss:$0 sps:$4 sm:$0xff]  }
  0x3a   : > { %2417 = vmatprep.mubr.msk.bf16.mxu0 %vm2658_vm1, %v2657_v1  ;;  %2399 = vmatprep.mubr.msk.bf16.mxu1 %vm2658_vm1, %v2657_v1 }
  0x41   : > { %2418 = vmatmul.mubr.msk.bf16.gmra.mxu0 %vm470_vm2, %v796_v40  ;;  %2400 = vmatmul.mubr.msk.bf16.gmra.mxu1 %vm470_vm2, %v2601_v54 }
  0x42   : > { %2421 = vmatprep.mubr.msk.bf16.mxu0 %vm2658_vm1, %v2657_v1  ;;  %2427 = vmatprep.mubr.msk.bf16.mxu1 %vm2658_vm1, %v2657_v1 }
  0x49   : > { %2422 = vmatmul.mubr.msk.bf16.gmra.mxu0 %vm470_vm2, %v799_v4  ;;  %2428 = vmatmul.mubr.msk.bf16.vlgmr.msra.gmra.mxu1 %vm470_vm2, %v2603_v8 }
  0x4a   : > { %2449 = vmatprep.mubr.msk.bf16.mxu0 %vm2658_vm1, %v2657_v1  ;;  %2470 = vmatpush3.bf16.msra.mxu1 %v1311_v9 }
  0x4b   : > { %2431 = vmatprep.mubr.msk.bf16.mxu1 %vm2658_vm1, %v2657_v1  ;;  %2513 = vmatprep.subr.bf16.mxu1 %v2657_v1 }
  0x51   : > { %2450 = vmatmul.mubr.msk.bf16.vlgmr.msra.gmra.mxu0 %vm470_vm2, %v2605_v12  ;;  %2432 = vmatmul.mubr.msk.bf16.gmra.mxu1 %vm470_vm2, %v2604_v14 }
  0x52   : > { %2492 = vmatpush3.bf16.msra.mxu0 %v1504_v15  ;;  %2435 = vmatprep.mubr.msk.bf16.mxu1 %vm2658_vm1, %v2657_v1 }
  0x53   : > { %2453 = vmatprep.mubr.msk.bf16.mxu0 %vm2658_vm1, %v2657_v1  ;;  %2535 = vmatprep.subr.bf16.mxu0 %v2657_v1 }
  0x59   : > { %2454 = vmatmul.mubr.msk.bf16.gmra.mxu0 %vm470_vm2, %v2607_v16  ;;  %2436 = vmatmul.mubr.msk.bf16.gmra.mxu1 %vm470_vm2, %v2606_v17 }
  0x5a   : > { %2457 = vmatprep.mubr.msk.bf16.mxu0 %vm2658_vm1, %v2657_v1  ;;  %2439 = vmatprep.mubr.msk.bf16.mxu1 %vm2658_vm1, %v2657_v1 }
  0x61   : > { %2458 = vmatmul.mubr.msk.bf16.gmra.mxu0 %vm470_vm2, %v2609_v18  ;;  %2440 = vmatmul.mubr.msk.bf16.gmra.mxu1 %vm470_vm2, %v2608_v20 }
  0x62   : > { %2461 = vmatprep.mubr.msk.bf16.mxu0 %vm2658_vm1, %v2657_v1  ;;  %2443 = vmatprep.mubr.msk.bf16.mxu1 %vm2658_vm1, %v2657_v1 }
  0x69   : > { %2462 = vmatmul.mubr.msk.bf16.gmra.mxu0 %vm470_vm2, %v2611_v21  ;;  %2444 = vmatmul.mubr.msk.bf16.gmra.mxu1 %vm470_vm2, %v2610_v23 }
  0x6a   : > { %2465 = vmatprep.mubr.msk.bf16.mxu0 %vm2658_vm1, %v2657_v1  ;;  %2471 = vmatprep.mubr.msk.bf16.mxu1 %vm2658_vm1, %v2657_v1 }
  0x71   : > { %2466 = vmatmul.mubr.msk.bf16.gmra.mxu0 %vm470_vm2, %v2612_v24  ;;  %2472 = vmatmul.mubr.msk.bf16.vlgmr.msra.gmra.mxu1 %vm470_vm2, %v2825_v5  ;;  %v1292_v5 = vshrl.u32 %v2834_v11, 16 }
  0x72   : > { %2493 = vmatprep.mubr.msk.bf16.mxu0 %vm2658_vm1, %v2657_v1  ;;  %2514 = vmatpush3.bf16.msra.mxu1 %v1697_v27 }
  0x73   : > { %2475 = vmatprep.mubr.msk.bf16.mxu1 %vm2658_vm1, %v2657_v1 }
  0x79   : > { %2494 = vmatmul.mubr.msk.bf16.vlgmr.msra.gmra.mxu0 %vm470_vm2, %v2845_v19  ;;  %2476 = vmatmul.mubr.msk.bf16.gmra.mxu1 %vm470_vm2, %v2828_v6  ;;  %v1294_v6 = vor.u32 %v1292_v5, %v2857_v29  ;;  %v2626_v19 = vld [vmem:[%s2736_s10 + $0x4] sm:$0xfe]  }
  0x7a   : > { %2536 = vmatpush3.bf16.msra.mxu0 %v1861_v32  ;;  %2479 = vmatprep.mubr.msk.bf16.mxu1 %vm2658_vm1, %v2657_v1 }
  0x7b   : > { %2497 = vmatprep.mubr.msk.bf16.mxu0 %vm2658_vm1, %v2657_v1 }
  0x81   : > { %2498 = vmatmul.mubr.msk.bf16.gmra.mxu0 %vm470_vm2, %v2855_v28  ;;  %2480 = vmatmul.mubr.msk.bf16.gmra.mxu1 %vm470_vm2, %v2840_v13  ;;  %v1485_v13 = vshrl.u32 %v2851_v25, 16  ;;  %v2627_v28 = vld [vmem:[%s2736_s10 + $0xc] sm:$0xff]   ;;  %v1836_v25 = vrot.slane %v2626_v19, 1 }
  0x82   : > { %2501 = vmatprep.mubr.msk.bf16.mxu0 %vm2658_vm1, %v2657_v1  ;;  %2483 = vmatprep.mubr.msk.bf16.mxu1 %vm2658_vm1, %v2657_v1  ;;  %v1837_v29 = vrot.slane %v2627_v28, 1 }
  0x83   : > { %v1487_v11 = vor.u32 %v1485_v13, %v2869_v43  ;;  %v2632_v43 = vld [vmem:[%s2736_s10 + $0x24] sm:$0x1f]  }
  0x84   : > { %v1838_v33 = vsel %vm1835_vm4, %v1836_v25, %v1837_v29  ;;  %v1843_v45 = vrot.slane %v2632_v43, 1 }
  0x89   : > { %2502 = vmatmul.mubr.msk.bf16.gmra.mxu0 %vm470_vm2, %v2865_v39  ;;  %2484 = vmatmul.mubr.msk.bf16.gmra.mxu1 %vm470_vm2, %v2862_v38  ;;  %v1840_v38 = vsel %vm1835_vm4, %v1837_v29, %v1839_v35  ;;  %v2631_v39 = vld [vmem:[%s2736_s10 + $0x1c] sm:$0xff]   ;;  %s2561_s10 = smul.u32 72, %s3198_s21 }
  0x8a   : > { %2505 = vmatprep.mubr.msk.bf16.mxu0 %vm2658_vm1, %v2657_v1  ;;  %2487 = vmatprep.mubr.msk.bf16.mxu1 %vm2658_vm1, %v2657_v1  ;;  %v1841_v41 = vrot.slane %v2631_v39, 1 }
  0x8b   : > { %s3137_s21 = scalar_lea.vmem %s3192_s6, %s2561_s10 }
  0x8c   : > { %v1842_v42 = vsel %vm1835_vm4, %v1839_v35, %v1841_v41  ;;  %v1844_v47 = vsel %vm1835_vm4, %v1841_v41, %v1843_v45 }
  0x91   : > { %2506 = vmatmul.mubr.msk.bf16.gmra.mxu0 %vm470_vm2, %v2883_v50  ;;  %2488 = vmatmul.mubr.msk.bf16.gmra.mxu1 %vm470_vm2, %v1294_v6 }
  0x92   : > { %2509 = vmatprep.mubr.msk.bf16.mxu0 %vm2658_vm1, %v2657_v1  ;;  %2515 = vmatprep.mubr.msk.bf16.mxu1 %vm2658_vm1, %v2657_v1 }
  0x99   : > { %2510 = vmatmul.mubr.msk.bf16.gmra.mxu0 %vm470_vm2, %v1487_v11  ;;  %2516 = vmatmul.mubr.msk.bf16.vlgmr.msra.gmra.mxu1 %vm470_vm2, %v2888_v22 }
  0x9a   : > { %2537 = vmatprep.mubr.msk.bf16.mxu0 %vm2658_vm1, %v2657_v1  ;;  %2519 = vmatprep.mubr.msk.bf16.mxu1 %vm2658_vm1, %v2657_v1 }
  0xa1   : > { %2538 = vmatmul.mubr.msk.bf16.vlgmr.msra.gmra.mxu0 %vm470_vm2, %v1838_v33  ;;  %2520 = vmatmul.mubr.msk.bf16.gmra.mxu1 %vm470_vm2, %v2892_v57 }
  0xa2   : > { %2541 = vmatprep.mubr.msk.bf16.mxu0 %vm2658_vm1, %v2657_v1  ;;  %2523 = vmatprep.mubr.msk.bf16.mxu1 %vm2658_vm1, %v2657_v1 }
  0xa9   : > { %2542 = vmatmul.mubr.msk.bf16.gmra.mxu0 %vm470_vm2, %v1840_v38  ;;  %2524 = vmatmul.mubr.msk.bf16.gmra.mxu1 %vm470_vm2, %v2904_v0 }
  0xaa   : > { %2545 = vmatprep.mubr.msk.bf16.mxu0 %vm2658_vm1, %v2657_v1  ;;  %2527 = vmatprep.mubr.msk.bf16.mxu1 %vm2658_vm1, %v2657_v1 }
  0xb1   : > { %2546 = vmatmul.mubr.msk.bf16.gmra.mxu0 %vm470_vm2, %v1842_v42  ;;  %2528 = vmatmul.mubr.msk.bf16.gmra.mxu1 %vm470_vm2, %v2915_v7 }
  0xb2   : > { %2549 = vmatprep.mubr.msk.bf16.mxu0 %vm2658_vm1, %v2657_v1  ;;  %2531 = vmatprep.mubr.msk.bf16.mxu1 %vm2658_vm1, %v2657_v1 }
  0xb9   : > { %2550 = vmatmul.mubr.msk.bf16.gmra.mxu0 %vm470_vm2, %v1844_v47  ;;  %2532 = vmatmul.mubr.msk.bf16.gmra.mxu1 %vm470_vm2, %v1680_v46 }
  0xba   : > { %2553 = vmatprep.mubr.msk.bf16.mxu0 %vm2658_vm1, %v2657_v1 }
  0xc1   : > { %2554 = vmatmul.mubr.msk.bf16.gmra.mxu0 %vm470_vm2, %v1843_v45 }
  0xd1   : > { %v524_v48 = vpop.f32.mrf.mxu0  ;;  %v548_v49 = vpop.f32.mrf.mxu1 }
  0xd2   : > { %563 = vst.msk [vmem:[#allocation2] sm:$0xff] %vm562_vm5, %v524_v48  ;;  %569 = vst.msk [vmem:[#allocation2 + $0x30] sm:$0xff] %vm562_vm5, %v548_v49 }
  0xd3   : > { %v2363_v50 = vpop.f32.mrf.mxu0  ;;  %v2375_v51 = vpop.f32.mrf.mxu1 }
  0xd5   : > { %v527_v52 = vpop.f32.mrf.mxu0  ;;  %v551_v53 = vpop.f32.mrf.mxu1 }
  0xd6   : > { %564 = vst.msk [vmem:[#allocation2 + $0x8] sm:$0xff] %vm562_vm5, %v527_v52  ;;  %570 = vst.msk [vmem:[#allocation2 + $0x38] sm:$0xff] %vm562_vm5, %v551_v53 }
  0xd7   : > { %v2364_v54 = vpop.f32.mrf.mxu0  ;;  %v2376_v55 = vpop.f32.mrf.mxu1 }
  0xd9   : > { %v532_v1 = vpop.f32.mrf.mxu0  ;;  %v556_v22 = vpop.f32.mrf.mxu1  ;;  %v696_v61 = vld [vmem:[#allocation2] sm:$0xff]  ;;  %v702_v46 = vld [vmem:[#allocation2 + $0x30] sm:$0xff] }
  0xda   : > { %565 = vst.msk [vmem:[#allocation2 + $0x10] sm:$0xff] %vm562_vm5, %v532_v1  ;;  %571 = vst.msk [vmem:[#allocation2 + $0x40] sm:$0xff] %vm562_vm5, %v556_v22 }
  0xdb   : > { %v2367_v36 = vpop.f32.mrf.mxu0  ;;  %v2379_v37 = vpop.f32.mrf.mxu1 }
  0xdd   : > { %v535_v40 = vpop.f32.mrf.mxu0  ;;  %v559_v56 = vpop.f32.mrf.mxu1  ;;  %v697_v4 = vld [vmem:[#allocation2 + $0x8] sm:$0xff]  ;;  %v703_v54 = vld [vmem:[#allocation2 + $0x38] sm:$0xff] }
  0xde   : > { %566 = vst.msk [vmem:[#allocation2 + $0x18] sm:$0xff] %vm562_vm5, %v535_v40 }
  0xdf   : > { %v2368_v57 = vpop.f32.mrf.mxu0  ;;  %v2380_v58 = vpop.f32.mrf.mxu1 }
  0xe1   : > { %v540_v59 = vpop.f32.mrf.mxu0  ;;  %v658_v60 = vpop.f32.mrf.mxu1  ;;  %v698_v12 = vld [vmem:[#allocation2 + $0x10] sm:$0xff]  ;;  %v704_v57 = vld [vmem:[#allocation2 + $0x40] sm:$0xff] }
  0xe2   : > { %567 = vst.msk [vmem:[#allocation2 + $0x20] sm:$0xff] %vm562_vm5, %v540_v59  ;;  %v705_v62 = vadd.f32 %v696_v61, %v658_v60 }
  0xe3   : > { %v2371_v63 = vpop.f32.mrf.mxu0  ;;  %v2385_v0 = vpop.f32.mrf.mxu1 }
  0xe4   : > { %714 = vst.msk [vmem:[#allocation2] sm:$0xff] %vm562_vm5, %v705_v62 }
  0xe5   : > { %v543_v2 = vpop.f32.mrf.mxu0  ;;  %v661_v3 = vpop.f32.mrf.mxu1  ;;  %v699_v23 = vld [vmem:[#allocation2 + $0x18] sm:$0xff] }
  0xe6   : > { %568 = vst.msk [vmem:[#allocation2 + $0x28] sm:$0xff] %vm562_vm5, %v543_v2  ;;  %v706_v31 = vadd.f32 %v697_v4, %v661_v3 }
  0xe7   : > { %v2372_v7 = vpop.f32.mrf.mxu0  ;;  %v2386_v8 = vpop.f32.mrf.mxu1 }
  0xe8   : > { %715 = vst.msk [vmem:[#allocation2 + $0x8] sm:$0xff] %vm562_vm5, %v706_v31 }
  0xe9   : > { %v852_v9 = vpop.f32.mrf.mxu0  ;;  %v666_v10 = vpop.f32.mrf.mxu1  ;;  %v700_v13 = vld [vmem:[#allocation2 + $0x20] sm:$0xff] }
  0xea   : > { %v707_v14 = vadd.f32 %v698_v12, %v666_v10 }
  0xeb   : > { %v2407_v15 = vpop.f32.mrf.mxu0  ;;  %v890_v16 = vld [vmem:[#allocation2] sm:$0xff]  ;;  %v2389_v17 = vpop.f32.mrf.mxu1 }
  0xec   : > { %716 = vst.msk [vmem:[#allocation2 + $0x10] sm:$0xff] %vm562_vm5, %v707_v14  ;;  %v899_v18 = vadd.f32 %v890_v16, %v852_v9 }
  0xed   : > { %v855_v20 = vpop.f32.mrf.mxu0  ;;  %v669_v21 = vpop.f32.mrf.mxu1  ;;  %v701_v35 = vld [vmem:[#allocation2 + $0x28] sm:$0xff] }
  0xee   : > { %908 = vst.msk [vmem:[#allocation2] sm:$0xff] %vm562_vm5, %v899_v18  ;;  %v708_v24 = vadd.f32 %v699_v23, %v669_v21 }
  0xef   : > { %v2408_v26 = vpop.f32.mrf.mxu0  ;;  %v891_v27 = vld [vmem:[#allocation2 + $0x8] sm:$0xff]  ;;  %v2390_v30 = vpop.f32.mrf.mxu1 }
  0xf0   : > { %717 = vst.msk [vmem:[#allocation2 + $0x18] sm:$0xff] %vm562_vm5, %v708_v24  ;;  %v900_v32 = vadd.f32 %v891_v27, %v855_v20 }
  0xf1   : > { %v860_v5 = vpop.f32.mrf.mxu0  ;;  %v674_v6 = vpop.f32.mrf.mxu1 }
  0xf2   : > { %909 = vst.msk [vmem:[#allocation2 + $0x8] sm:$0xff] %vm562_vm5, %v900_v32  ;;  %v709_v11 = vadd.f32 %v700_v13, %v674_v6 }
  0xf3   : > { %v2411_v19 = vpop.f32.mrf.mxu0  ;;  %v892_v28 = vld [vmem:[#allocation2 + $0x10] sm:$0xff]  ;;  %v2393_v25 = vpop.f32.mrf.mxu1 }
  0xf4   : > { %718 = vst.msk [vmem:[#allocation2 + $0x20] sm:$0xff] %vm562_vm5, %v709_v11  ;;  %v901_v29 = vadd.f32 %v892_v28, %v860_v5 }
  0xf5   : > { %v863_v33 = vpop.f32.mrf.mxu0  ;;  %v677_v34 = vpop.f32.mrf.mxu1  ;;  %v1041_v9 = vld [vmem:[#allocation2] sm:$0xff] }
  0xf6   : > { %910 = vst.msk [vmem:[#allocation2 + $0x10] sm:$0xff] %vm562_vm5, %v901_v29  ;;  %v710_v38 = vadd.f32 %v701_v35, %v677_v34 }
  0xf7   : > { %v2412_v39 = vpop.f32.mrf.mxu0  ;;  %v893_v41 = vld [vmem:[#allocation2 + $0x18] sm:$0xff]  ;;  %v2394_v42 = vpop.f32.mrf.mxu1 }
  0xf8   : > { %719 = vst.msk [vmem:[#allocation2 + $0x28] sm:$0xff] %vm562_vm5, %v710_v38  ;;  %v902_v43 = vadd.f32 %v893_v41, %v863_v33 }
  0xf9   : > { %v868_v44 = vpop.f32.mrf.mxu0  ;;  %v682_v45 = vpop.f32.mrf.mxu1  ;;  %v1042_v20 = vld [vmem:[#allocation2 + $0x8] sm:$0xff] }
  0xfa   : > { %911 = vst.msk [vmem:[#allocation2 + $0x18] sm:$0xff] %vm562_vm5, %v902_v43  ;;  %v711_v47 = vadd.f32 %v702_v46, %v682_v45 }
  0xfb   : > { %v2415_v48 = vpop.f32.mrf.mxu0  ;;  %v894_v49 = vld [vmem:[#allocation2 + $0x20] sm:$0xff]  ;;  %v2397_v50 = vpop.f32.mrf.mxu1 }
  0xfc   : > { %720 = vst.msk [vmem:[#allocation2 + $0x30] sm:$0xff] %vm562_vm5, %v711_v47  ;;  %v903_v51 = vadd.f32 %v894_v49, %v868_v44 }
  0xfd   : > { %v871_v52 = vpop.f32.mrf.mxu0  ;;  %v685_v53 = vpop.f32.mrf.mxu1  ;;  %v1043_v30 = vld [vmem:[#allocation2 + $0x10] sm:$0xff] }
  0xfe   : > { %912 = vst.msk [vmem:[#allocation2 + $0x20] sm:$0xff] %vm562_vm5, %v903_v51  ;;  %v712_v55 = vadd.f32 %v703_v54, %v685_v53 }
  0xff   : > { %v2416_v1 = vpop.f32.mrf.mxu0  ;;  %v895_v22 = vld [vmem:[#allocation2 + $0x28] sm:$0xff]  ;;  %v2398_v36 = vpop.f32.mrf.mxu1 }
 0x100   : > { %721 = vst.msk [vmem:[#allocation2 + $0x38] sm:$0xff] %vm562_vm5, %v712_v55  ;;  %v904_v37 = vadd.f32 %v895_v22, %v871_v52 }
 0x101   : > { %v876_v40 = vpop.f32.mrf.mxu0  ;;  %v690_v56 = vpop.f32.mrf.mxu1  ;;  %v1044_v25 = vld [vmem:[#allocation2 + $0x18] sm:$0xff] }
 0x102   : > { %913 = vst.msk [vmem:[#allocation2 + $0x28] sm:$0xff] %vm562_vm5, %v904_v37  ;;  %v713_v58 = vadd.f32 %v704_v57, %v690_v56 }
 0x103   : > { %v2419_v59 = vpop.f32.mrf.mxu0  ;;  %v896_v60 = vld [vmem:[#allocation2 + $0x30] sm:$0xff]  ;;  %v2401_v61 = vpop.f32.mrf.mxu1 }
 0x104   : > { %722 = vst.msk [vmem:[#allocation2 + $0x40] sm:$0xff] %vm562_vm5, %v713_v58  ;;  %v905_v62 = vadd.f32 %v896_v60, %v876_v40 }
 0x105   : > { %v879_v63 = vpop.f32.mrf.mxu0  ;;  %v693_v0 = vpop.f32.mrf.mxu1  ;;  %v1045_v42 = vld [vmem:[#allocation2 + $0x20] sm:$0xff] }
 0x106   : > { %914 = vst.msk [vmem:[#allocation2 + $0x30] sm:$0xff] %vm562_vm5, %v905_v62 }
 0x107   : > { %v2420_v2 = vpop.f32.mrf.mxu0  ;;  %v897_v3 = vld [vmem:[#allocation2 + $0x38] sm:$0xff]  ;;  %v2402_v4 = vpop.f32.mrf.mxu1 }
 0x108   : > { %v906_v31 = vadd.f32 %v897_v3, %v879_v63 }
 0x109   : > { %v884_v7 = vpop.f32.mrf.mxu0  ;;  %v1003_v8 = vpop.f32.mrf.mxu1  ;;  %v1046_v50 = vld [vmem:[#allocation2 + $0x28] sm:$0xff] }
 0x10a   : > { %915 = vst.msk [vmem:[#allocation2 + $0x38] sm:$0xff] %vm562_vm5, %v906_v31  ;;  %v1050_v10 = vadd.f32 %v1041_v9, %v1003_v8 }
 0x10b   : > { %v2423_v12 = vpop.f32.mrf.mxu0  ;;  %v898_v14 = vld [vmem:[#allocation2 + $0x40] sm:$0xff]  ;;  %v2429_v15 = vpop.f32.mrf.mxu1 }
 0x10c   : > { %v907_v16 = vadd.f32 %v898_v14, %v884_v7  ;;  %1059 = vst.msk [vmem:[#allocation2] sm:$0xff] %vm562_vm5, %v1050_v10 }
 0x10d   : > { %v887_v17 = vpop.f32.mrf.mxu0  ;;  %v1006_v18 = vpop.f32.mrf.mxu1  ;;  %v1047_v36 = vld [vmem:[#allocation2 + $0x30] sm:$0xff] }
 0x10e   : > { %916 = vst.msk [vmem:[#allocation2 + $0x40] sm:$0xff] %vm562_vm5, %v907_v16  ;;  %v1051_v21 = vadd.f32 %v1042_v20, %v1006_v18 }
 0x10f   : > { %v2424_v23 = vpop.f32.mrf.mxu0  ;;  %v2430_v24 = vpop.f32.mrf.mxu1 }
 0x110   : > { %1060 = vst.msk [vmem:[#allocation2 + $0x8] sm:$0xff] %vm562_vm5, %v1051_v21 }
 0x111   : > { %v1154_v26 = vpop.f32.mrf.mxu0  ;;  %v1011_v27 = vpop.f32.mrf.mxu1  ;;  %v1048_v61 = vld [vmem:[#allocation2 + $0x38] sm:$0xff] }
 0x112   : > { %v1052_v32 = vadd.f32 %v1043_v30, %v1011_v27 }
 0x113   : > { %v2451_v5 = vpop.f32.mrf.mxu0  ;;  %v1192_v6 = vld [vmem:[#allocation2] sm:$0xff]  ;;  %v2433_v13 = vpop.f32.mrf.mxu1 }
 0x114   : > { %1061 = vst.msk [vmem:[#allocation2 + $0x10] sm:$0xff] %vm562_vm5, %v1052_v32  ;;  %v1201_v11 = vadd.f32 %v1192_v6, %v1154_v26 }
 0x115   : > { %v1157_v19 = vpop.f32.mrf.mxu0  ;;  %v1014_v28 = vpop.f32.mrf.mxu1  ;;  %v1049_v7 = vld [vmem:[#allocation2 + $0x40] sm:$0xff] }
 0x116   : > { %1210 = vst.msk [vmem:[#allocation2] sm:$0xff] %vm562_vm5, %v1201_v11  ;;  %v1053_v29 = vadd.f32 %v1044_v25, %v1014_v28 }
 0x117   : > { %v2452_v33 = vpop.f32.mrf.mxu0  ;;  %v1193_v34 = vld [vmem:[#allocation2 + $0x8] sm:$0xff]  ;;  %v2434_v35 = vpop.f32.mrf.mxu1 }
 0x118   : > { %1062 = vst.msk [vmem:[#allocation2 + $0x18] sm:$0xff] %vm562_vm5, %v1053_v29  ;;  %v1202_v38 = vadd.f32 %v1193_v34, %v1157_v19 }
 0x119   : > { %v1162_v39 = vpop.f32.mrf.mxu0  ;;  %v1019_v41 = vpop.f32.mrf.mxu1 }
 0x11a   : > { %1211 = vst.msk [vmem:[#allocation2 + $0x8] sm:$0xff] %vm562_vm5, %v1202_v38  ;;  %v1054_v43 = vadd.f32 %v1045_v42, %v1019_v41 }
 0x11b   : > { %v2455_v44 = vpop.f32.mrf.mxu0  ;;  %v1194_v45 = vld [vmem:[#allocation2 + $0x10] sm:$0xff]  ;;  %v2437_v46 = vpop.f32.mrf.mxu1 }
 0x11c   : > { %1063 = vst.msk [vmem:[#allocation2 + $0x20] sm:$0xff] %vm562_vm5, %v1054_v43  ;;  %v1203_v47 = vadd.f32 %v1194_v45, %v1162_v39 }
 0x11d   : > { %v1165_v48 = vpop.f32.mrf.mxu0  ;;  %v1022_v49 = vpop.f32.mrf.mxu1  ;;  %v1385_v26 = vld [vmem:[#allocation2] sm:$0xff] }
 0x11e   : > { %1212 = vst.msk [vmem:[#allocation2 + $0x10] sm:$0xff] %vm562_vm5, %v1203_v47  ;;  %v1055_v51 = vadd.f32 %v1046_v50, %v1022_v49 }
 0x11f   : > { %v2456_v52 = vpop.f32.mrf.mxu0  ;;  %v1195_v53 = vld [vmem:[#allocation2 + $0x18] sm:$0xff]  ;;  %v2438_v54 = vpop.f32.mrf.mxu1 }
 0x120   : > { %1064 = vst.msk [vmem:[#allocation2 + $0x28] sm:$0xff] %vm562_vm5, %v1055_v51  ;;  %v1204_v55 = vadd.f32 %v1195_v53, %v1165_v48 }
 0x121   : > { %v1170_v1 = vpop.f32.mrf.mxu0  ;;  %v1027_v22 = vpop.f32.mrf.mxu1  ;;  %v1386_v19 = vld [vmem:[#allocation2 + $0x8] sm:$0xff] }
 0x122   : > { %1213 = vst.msk [vmem:[#allocation2 + $0x18] sm:$0xff] %vm562_vm5, %v1204_v55  ;;  %v1056_v37 = vadd.f32 %v1047_v36, %v1027_v22 }
 0x123   : > { %v2459_v40 = vpop.f32.mrf.mxu0  ;;  %v1196_v56 = vld [vmem:[#allocation2 + $0x20] sm:$0xff]  ;;  %v2441_v57 = vpop.f32.mrf.mxu1 }
 0x124   : > { %1065 = vst.msk [vmem:[#allocation2 + $0x30] sm:$0xff] %vm562_vm5, %v1056_v37  ;;  %v1205_v58 = vadd.f32 %v1196_v56, %v1170_v1 }
 0x125   : > { %v1173_v59 = vpop.f32.mrf.mxu0  ;;  %v1030_v60 = vpop.f32.mrf.mxu1  ;;  %v1387_v35 = vld [vmem:[#allocation2 + $0x10] sm:$0xff] }
 0x126   : > { %1214 = vst.msk [vmem:[#allocation2 + $0x20] sm:$0xff] %vm562_vm5, %v1205_v58  ;;  %v1057_v62 = vadd.f32 %v1048_v61, %v1030_v60 }
 0x127   : > { %v2460_v63 = vpop.f32.mrf.mxu0  ;;  %v1197_v0 = vld [vmem:[#allocation2 + $0x28] sm:$0xff]  ;;  %v2442_v2 = vpop.f32.mrf.mxu1 }
 0x128   : > { %1066 = vst.msk [vmem:[#allocation2 + $0x38] sm:$0xff] %vm562_vm5, %v1057_v62  ;;  %v1206_v3 = vadd.f32 %v1197_v0, %v1173_v59 }
 0x129   : > { %v1178_v4 = vpop.f32.mrf.mxu0  ;;  %v1035_v31 = vpop.f32.mrf.mxu1  ;;  %v1388_v46 = vld [vmem:[#allocation2 + $0x18] sm:$0xff] }
 0x12a   : > { %1215 = vst.msk [vmem:[#allocation2 + $0x28] sm:$0xff] %vm562_vm5, %v1206_v3  ;;  %v1058_v8 = vadd.f32 %v1049_v7, %v1035_v31 }
 0x12b   : > { %v2463_v9 = vpop.f32.mrf.mxu0  ;;  %v1198_v10 = vld [vmem:[#allocation2 + $0x30] sm:$0xff]  ;;  %v2445_v12 = vpop.f32.mrf.mxu1 }
 0x12c   : > { %1067 = vst.msk [vmem:[#allocation2 + $0x40] sm:$0xff] %vm562_vm5, %v1058_v8  ;;  %v1207_v14 = vadd.f32 %v1198_v10, %v1178_v4 }
 0x12d   : > { %v1181_v15 = vpop.f32.mrf.mxu0  ;;  %v1038_v16 = vpop.f32.mrf.mxu1  ;;  %v1389_v54 = vld [vmem:[#allocation2 + $0x20] sm:$0xff] }
 0x12e   : > { %1216 = vst.msk [vmem:[#allocation2 + $0x30] sm:$0xff] %vm562_vm5, %v1207_v14 }
 0x12f   : > { %v2464_v17 = vpop.f32.mrf.mxu0  ;;  %v1199_v18 = vld [vmem:[#allocation2 + $0x38] sm:$0xff]  ;;  %v2446_v20 = vpop.f32.mrf.mxu1 }
 0x130   : > { %v1208_v21 = vadd.f32 %v1199_v18, %v1181_v15 }
 0x131   : > { %v1186_v23 = vpop.f32.mrf.mxu0  ;;  %v1347_v24 = vpop.f32.mrf.mxu1  ;;  %v1390_v57 = vld [vmem:[#allocation2 + $0x28] sm:$0xff] }
 0x132   : > { %1217 = vst.msk [vmem:[#allocation2 + $0x38] sm:$0xff] %vm562_vm5, %v1208_v21  ;;  %v1394_v27 = vadd.f32 %v1385_v26, %v1347_v24 }
 0x133   : > { %v2467_v30 = vpop.f32.mrf.mxu0  ;;  %v1200_v32 = vld [vmem:[#allocation2 + $0x40] sm:$0xff]  ;;  %v2473_v5 = vpop.f32.mrf.mxu1 }
 0x134   : > { %v1209_v6 = vadd.f32 %v1200_v32, %v1186_v23  ;;  %1403 = vst.msk [vmem:[#allocation2] sm:$0xff] %vm562_vm5, %v1394_v27 }
 0x135   : > { %v1189_v13 = vpop.f32.mrf.mxu0  ;;  %v1350_v11 = vpop.f32.mrf.mxu1  ;;  %v1391_v2 = vld [vmem:[#allocation2 + $0x30] sm:$0xff] }
 0x136   : > { %1218 = vst.msk [vmem:[#allocation2 + $0x40] sm:$0xff] %vm562_vm5, %v1209_v6  ;;  %v1395_v28 = vadd.f32 %v1386_v19, %v1350_v11 }
 0x137   : > { %v2468_v25 = vpop.f32.mrf.mxu0  ;;  %v2474_v29 = vpop.f32.mrf.mxu1 }
 0x138   : > { %1404 = vst.msk [vmem:[#allocation2 + $0x8] sm:$0xff] %vm562_vm5, %v1395_v28 }
 0x139   : > { %v1540_v33 = vpop.f32.mrf.mxu0  ;;  %v1355_v34 = vpop.f32.mrf.mxu1  ;;  %v1392_v12 = vld [vmem:[#allocation2 + $0x38] sm:$0xff] }
 0x13a   : > { %v1396_v38 = vadd.f32 %v1387_v35, %v1355_v34 }
 0x13b   : > { %v2495_v39 = vpop.f32.mrf.mxu0  ;;  %v1578_v41 = vld [vmem:[#allocation2] sm:$0xff]  ;;  %v2477_v42 = vpop.f32.mrf.mxu1 }
 0x13c   : > { %1405 = vst.msk [vmem:[#allocation2 + $0x10] sm:$0xff] %vm562_vm5, %v1396_v38  ;;  %v1587_v43 = vadd.f32 %v1578_v41, %v1540_v33 }
 0x13d   : > { %v1543_v44 = vpop.f32.mrf.mxu0  ;;  %v1358_v45 = vpop.f32.mrf.mxu1  ;;  %v1393_v23 = vld [vmem:[#allocation2 + $0x40] sm:$0xff] }
 0x13e   : > { %1596 = vst.msk [vmem:[#allocation2] sm:$0xff] %vm562_vm5, %v1587_v43  ;;  %v1397_v47 = vadd.f32 %v1388_v46, %v1358_v45 }
 0x13f   : > { %v2496_v48 = vpop.f32.mrf.mxu0  ;;  %v1579_v49 = vld [vmem:[#allocation2 + $0x8] sm:$0xff]  ;;  %v2478_v50 = vpop.f32.mrf.mxu1 }
 0x140   : > { %1406 = vst.msk [vmem:[#allocation2 + $0x18] sm:$0xff] %vm562_vm5, %v1397_v47  ;;  %v1588_v51 = vadd.f32 %v1579_v49, %v1543_v44 }
 0x141   : > { %v1548_v52 = vpop.f32.mrf.mxu0  ;;  %v1363_v53 = vpop.f32.mrf.mxu1 }
 0x142   : > { %1597 = vst.msk [vmem:[#allocation2 + $0x8] sm:$0xff] %vm562_vm5, %v1588_v51  ;;  %v1398_v55 = vadd.f32 %v1389_v54, %v1363_v53 }
 0x143   : > { %v2499_v1 = vpop.f32.mrf.mxu0  ;;  %v1580_v22 = vld [vmem:[#allocation2 + $0x10] sm:$0xff]  ;;  %v2481_v36 = vpop.f32.mrf.mxu1 }
 0x144   : > { %1407 = vst.msk [vmem:[#allocation2 + $0x20] sm:$0xff] %vm562_vm5, %v1398_v55  ;;  %v1589_v37 = vadd.f32 %v1580_v22, %v1548_v52 }
 0x145   : > { %v1551_v40 = vpop.f32.mrf.mxu0  ;;  %v1366_v56 = vpop.f32.mrf.mxu1  ;;  %v1771_v33 = vld [vmem:[#allocation2] sm:$0xff] }
 0x146   : > { %1598 = vst.msk [vmem:[#allocation2 + $0x10] sm:$0xff] %vm562_vm5, %v1589_v37  ;;  %v1399_v58 = vadd.f32 %v1390_v57, %v1366_v56 }
 0x147   : > { %v2500_v59 = vpop.f32.mrf.mxu0  ;;  %v1581_v60 = vld [vmem:[#allocation2 + $0x18] sm:$0xff]  ;;  %v2482_v61 = vpop.f32.mrf.mxu1 }
 0x148   : > { %1408 = vst.msk [vmem:[#allocation2 + $0x28] sm:$0xff] %vm562_vm5, %v1399_v58  ;;  %v1590_v62 = vadd.f32 %v1581_v60, %v1551_v40 }
 0x149   : > { %v1556_v63 = vpop.f32.mrf.mxu0  ;;  %v1371_v0 = vpop.f32.mrf.mxu1  ;;  %v1772_v44 = vld [vmem:[#allocation2 + $0x8] sm:$0xff] }
 0x14a   : > { %1599 = vst.msk [vmem:[#allocation2 + $0x18] sm:$0xff] %vm562_vm5, %v1590_v62  ;;  %v1400_v3 = vadd.f32 %v1391_v2, %v1371_v0  ;;  %v3131_v0 = vld [vmem:[%s3191_s5] ss:$0 sm:$0xff] }
 0x14b   : > { %v2503_v4 = vpop.f32.mrf.mxu0  ;;  %v1582_v31 = vld [vmem:[#allocation2 + $0x20] sm:$0xff]  ;;  %v2485_v7 = vpop.f32.mrf.mxu1 }
 0x14c   : > { %1409 = vst.msk [vmem:[#allocation2 + $0x30] sm:$0xff] %vm562_vm5, %v1400_v3  ;;  %v1591_v8 = vadd.f32 %v1582_v31, %v1556_v63 }
 0x14d   : > { %v1559_v9 = vpop.f32.mrf.mxu0  ;;  %v1374_v10 = vpop.f32.mrf.mxu1  ;;  %v1773_v50 = vld [vmem:[#allocation2 + $0x10] sm:$0xff] }
 0x14e   : > { %1600 = vst.msk [vmem:[#allocation2 + $0x20] sm:$0xff] %vm562_vm5, %v1591_v8  ;;  %v1401_v14 = vadd.f32 %v1392_v12, %v1374_v10 }
 0x14f   : > { %v2504_v15 = vpop.f32.mrf.mxu0  ;;  %v1583_v16 = vld [vmem:[#allocation2 + $0x28] sm:$0xff]  ;;  %v2486_v17 = vpop.f32.mrf.mxu1 }
 0x150   : > { %1410 = vst.msk [vmem:[#allocation2 + $0x38] sm:$0xff] %vm562_vm5, %v1401_v14  ;;  %v1592_v18 = vadd.f32 %v1583_v16, %v1559_v9 }
 0x151   : > { %v1564_v20 = vpop.f32.mrf.mxu0  ;;  %v1379_v21 = vpop.f32.mrf.mxu1  ;;  %v1774_v36 = vld [vmem:[#allocation2 + $0x18] sm:$0xff] }
 0x152   : > { %1601 = vst.msk [vmem:[#allocation2 + $0x28] sm:$0xff] %vm562_vm5, %v1592_v18  ;;  %v1402_v24 = vadd.f32 %v1393_v23, %v1379_v21 }
 0x153   : > { %v2507_v26 = vpop.f32.mrf.mxu0  ;;  %v1584_v27 = vld [vmem:[#allocation2 + $0x30] sm:$0xff]  ;;  %v2489_v30 = vpop.f32.mrf.mxu1 }
 0x154   : > { %1411 = vst.msk [vmem:[#allocation2 + $0x40] sm:$0xff] %vm562_vm5, %v1402_v24  ;;  %v1593_v32 = vadd.f32 %v1584_v27, %v1564_v20 }
 0x155   : > { %v1567_v5 = vpop.f32.mrf.mxu0  ;;  %v1382_v6 = vpop.f32.mrf.mxu1  ;;  %v1775_v61 = vld [vmem:[#allocation2 + $0x20] sm:$0xff] }
 0x156   : > { %1602 = vst.msk [vmem:[#allocation2 + $0x30] sm:$0xff] %vm562_vm5, %v1593_v32 }
 0x157   : > { %v2508_v13 = vpop.f32.mrf.mxu0  ;;  %v1585_v11 = vld [vmem:[#allocation2 + $0x38] sm:$0xff]  ;;  %v2490_v19 = vpop.f32.mrf.mxu1 }
 0x158   : > { %v1594_v28 = vadd.f32 %v1585_v11, %v1567_v5 }
 0x159   : > { %v1572_v25 = vpop.f32.mrf.mxu0  ;;  %v1733_v29 = vpop.f32.mrf.mxu1  ;;  %v1776_v9 = vld [vmem:[#allocation2 + $0x28] sm:$0xff] }
 0x15a   : > { %1603 = vst.msk [vmem:[#allocation2 + $0x38] sm:$0xff] %vm562_vm5, %v1594_v28  ;;  %v1780_v34 = vadd.f32 %v1771_v33, %v1733_v29 }
 0x15b   : > { %v2511_v35 = vpop.f32.mrf.mxu0  ;;  %v1586_v38 = vld [vmem:[#allocation2 + $0x40] sm:$0xff]  ;;  %v2517_v39 = vpop.f32.mrf.mxu1 }
 0x15c   : > { %v1595_v41 = vadd.f32 %v1586_v38, %v1572_v25  ;;  %1789 = vst.msk [vmem:[#allocation2] sm:$0xff] %vm562_vm5, %v1780_v34 }
 0x15d   : > { %v1575_v42 = vpop.f32.mrf.mxu0  ;;  %v1736_v43 = vpop.f32.mrf.mxu1  ;;  %v1777_v23 = vld [vmem:[#allocation2 + $0x30] sm:$0xff] }
 0x15e   : > { %1604 = vst.msk [vmem:[#allocation2 + $0x40] sm:$0xff] %vm562_vm5, %v1595_v41  ;;  %v1781_v45 = vadd.f32 %v1772_v44, %v1736_v43 }
 0x15f   : > { %v2512_v46 = vpop.f32.mrf.mxu0  ;;  %v2518_v47 = vpop.f32.mrf.mxu1 }
 0x160   : > { %1790 = vst.msk [vmem:[#allocation2 + $0x8] sm:$0xff] %vm562_vm5, %v1781_v45 }
 0x161   : > { %v1897_v48 = vpop.f32.mrf.mxu0  ;;  %v1741_v49 = vpop.f32.mrf.mxu1  ;;  %v1778_v19 = vld [vmem:[#allocation2 + $0x38] sm:$0xff] }
 0x162   : > { %v1782_v51 = vadd.f32 %v1773_v50, %v1741_v49 }
 0x163   : > { %v2539_v52 = vpop.f32.mrf.mxu0  ;;  %v1935_v53 = vld [vmem:[#allocation2] sm:$0xff]  ;;  %v2521_v54 = vpop.f32.mrf.mxu1 }
 0x164   : > { %1791 = vst.msk [vmem:[#allocation2 + $0x10] sm:$0xff] %vm562_vm5, %v1782_v51  ;;  %v1944_v55 = vadd.f32 %v1935_v53, %v1897_v48 }
 0x165   : > { %v1900_v1 = vpop.f32.mrf.mxu0  ;;  %v1744_v22 = vpop.f32.mrf.mxu1  ;;  %v1779_v42 = vld [vmem:[#allocation2 + $0x40] sm:$0xff] }
 0x166   : > { %1953 = vst.msk [vmem:[#allocation2] sm:$0xff] %vm562_vm5, %v1944_v55  ;;  %v1783_v37 = vadd.f32 %v1774_v36, %v1744_v22 }
 0x167   : > { %v2540_v40 = vpop.f32.mrf.mxu0  ;;  %v1936_v56 = vld [vmem:[#allocation2 + $0x8] sm:$0xff]  ;;  %v2522_v57 = vpop.f32.mrf.mxu1 }
 0x168   : > { %1792 = vst.msk [vmem:[#allocation2 + $0x18] sm:$0xff] %vm562_vm5, %v1783_v37  ;;  %v1945_v58 = vadd.f32 %v1936_v56, %v1900_v1 }
 0x169   : > { %v1905_v59 = vpop.f32.mrf.mxu0  ;;  %v1749_v60 = vpop.f32.mrf.mxu1 }
 0x16a   : > { %1954 = vst.msk [vmem:[#allocation2 + $0x8] sm:$0xff] %vm562_vm5, %v1945_v58  ;;  %v1784_v62 = vadd.f32 %v1775_v61, %v1749_v60 }
 0x16b   : > { %v2543_v63 = vpop.f32.mrf.mxu0  ;;  %v1937_v2 = vld [vmem:[#allocation2 + $0x10] sm:$0xff]  ;;  %v2525_v3 = vpop.f32.mrf.mxu1 }
 0x16c   : > { %1793 = vst.msk [vmem:[#allocation2 + $0x20] sm:$0xff] %vm562_vm5, %v1784_v62  ;;  %v1946_v4 = vadd.f32 %v1937_v2, %v1905_v59 }
 0x16d   : > { %v1908_v31 = vpop.f32.mrf.mxu0  ;;  %v1962_v7 = vld [vmem:[#allocation2] sm:$0xff]  ;;  %v1752_v8 = vpop.f32.mrf.mxu1 }
 0x16e   : > { %v1978_v10 = vadd.f32 %v3131_v0, %v1962_v7  ;;  %1955 = vst.msk [vmem:[#allocation2 + $0x10] sm:$0xff] %vm562_vm5, %v1946_v4  ;;  %v1785_v12 = vadd.f32 %v1776_v9, %v1752_v8 }
 0x16f   : > { %v2544_v14 = vpop.f32.mrf.mxu0  ;;  %v1938_v15 = vld [vmem:[#allocation2 + $0x18] sm:$0xff]  ;;  %v2526_v16 = vpop.f32.mrf.mxu1 }
 0x170   : > { %1987 = vst.msk [vmem:[%s3137_s21] sm:$0xff] %vm562_vm5, %v1978_v10  ;;  %1794 = vst.msk [vmem:[#allocation2 + $0x28] sm:$0xff] %vm562_vm5, %v1785_v12  ;;  %v1947_v17 = vadd.f32 %v1938_v15, %v1908_v31 }
 0x171   : > { %v1913_v18 = vpop.f32.mrf.mxu0  ;;  %v1963_v20 = vld [vmem:[#allocation2 + $0x8] sm:$0xff]  ;;  %v1757_v21 = vpop.f32.mrf.mxu1 }
 0x172   : > { %v1979_v24 = vadd.f32 %v3131_v0, %v1963_v20  ;;  %1956 = vst.msk [vmem:[#allocation2 + $0x18] sm:$0xff] %vm562_vm5, %v1947_v17  ;;  %v1786_v26 = vadd.f32 %v1777_v23, %v1757_v21 }
 0x173   : > { %v2547_v27 = vpop.f32.mrf.mxu0  ;;  %v1939_v30 = vld [vmem:[#allocation2 + $0x20] sm:$0xff]  ;;  %v2529_v32 = vpop.f32.mrf.mxu1 }
 0x174   : > { %1988 = vst.msk [vmem:[%s3137_s21 + $0x8] sm:$0xff] %vm562_vm5, %v1979_v24  ;;  %1795 = vst.msk [vmem:[#allocation2 + $0x30] sm:$0xff] %vm562_vm5, %v1786_v26  ;;  %v1948_v5 = vadd.f32 %v1939_v30, %v1913_v18 }
 0x175   : > { %v1916_v6 = vpop.f32.mrf.mxu0  ;;  %v1964_v13 = vld [vmem:[#allocation2 + $0x10] sm:$0xff]  ;;  %v1760_v11 = vpop.f32.mrf.mxu1 }
 0x176   : > { %v1980_v28 = vadd.f32 %v3131_v0, %v1964_v13  ;;  %1957 = vst.msk [vmem:[#allocation2 + $0x20] sm:$0xff] %vm562_vm5, %v1948_v5  ;;  %v1787_v25 = vadd.f32 %v1778_v19, %v1760_v11 }
 0x177   : > { %v2548_v29 = vpop.f32.mrf.mxu0  ;;  %v1940_v33 = vld [vmem:[#allocation2 + $0x28] sm:$0xff]  ;;  %v2530_v34 = vpop.f32.mrf.mxu1 }
 0x178   : > { %1989 = vst.msk [vmem:[%s3137_s21 + $0x10] sm:$0xff] %vm562_vm5, %v1980_v28  ;;  %1796 = vst.msk [vmem:[#allocation2 + $0x38] sm:$0xff] %vm562_vm5, %v1787_v25  ;;  %v1949_v35 = vadd.f32 %v1940_v33, %v1916_v6 }
 0x179   : > { %v1921_v38 = vpop.f32.mrf.mxu0  ;;  %v1965_v39 = vld [vmem:[#allocation2 + $0x18] sm:$0xff]  ;;  %v1765_v41 = vpop.f32.mrf.mxu1 }
 0x17a   : > { %v1981_v43 = vadd.f32 %v3131_v0, %v1965_v39  ;;  %1958 = vst.msk [vmem:[#allocation2 + $0x28] sm:$0xff] %vm562_vm5, %v1949_v35  ;;  %v1788_v44 = vadd.f32 %v1779_v42, %v1765_v41 }
 0x17b   : > { %v2551_v45 = vpop.f32.mrf.mxu0  ;;  %v1941_v46 = vld [vmem:[#allocation2 + $0x30] sm:$0xff]  ;;  %v2533_v47 = vpop.f32.mrf.mxu1 }
 0x17c   : > { %1990 = vst.msk [vmem:[%s3137_s21 + $0x18] sm:$0xff] %vm562_vm5, %v1981_v43  ;;  %1797 = vst.msk [vmem:[#allocation2 + $0x40] sm:$0xff] %vm562_vm5, %v1788_v44  ;;  %v1950_v48 = vadd.f32 %v1941_v46, %v1921_v38 }
 0x17d   : > { %v1924_v49 = vpop.f32.mrf.mxu0  ;;  %v1966_v50 = vld [vmem:[#allocation2 + $0x20] sm:$0xff]  ;;  %v1768_v51 = vpop.f32.mrf.mxu1 }
 0x17e   : > { %v1982_v52 = vadd.f32 %v3131_v0, %v1966_v50  ;;  %1959 = vst.msk [vmem:[#allocation2 + $0x30] sm:$0xff] %vm562_vm5, %v1950_v48 }
 0x17f   : > { %v2552_v53 = vpop.f32.mrf.mxu0  ;;  %v1942_v54 = vld [vmem:[#allocation2 + $0x38] sm:$0xff]  ;;  %v2534_v55 = vpop.f32.mrf.mxu1 }
 0x180   : > { %1991 = vst.msk [vmem:[%s3137_s21 + $0x20] sm:$0xff] %vm562_vm5, %v1982_v52  ;;  %v1951_v1 = vadd.f32 %v1942_v54, %v1924_v49 }
 0x181   : > { %v1929_v22 = vpop.f32.mrf.mxu0  ;;  %v1967_v36 = vld [vmem:[#allocation2 + $0x28] sm:$0xff] }
 0x182   : > { %v1983_v37 = vadd.f32 %v3131_v0, %v1967_v36  ;;  %1960 = vst.msk [vmem:[#allocation2 + $0x38] sm:$0xff] %vm562_vm5, %v1951_v1 }
 0x183   : > { %v2555_v40 = vpop.f32.mrf.mxu0  ;;  %v1943_v56 = vld [vmem:[#allocation2 + $0x40] sm:$0xff] }
 0x184   : > { %1992 = vst.msk [vmem:[%s3137_s21 + $0x28] sm:$0xff] %vm562_vm5, %v1983_v37  ;;  %v1952_v57 = vadd.f32 %v1943_v56, %v1929_v22 }
 0x185   : > { %v1932_v58 = vpop.f32.mrf.mxu0  ;;  %v1968_v59 = vld [vmem:[#allocation2 + $0x30] sm:$0xff] }
 0x186   : > { %v1984_v60 = vadd.f32 %v3131_v0, %v1968_v59  ;;  %1961 = vst.msk [vmem:[#allocation2 + $0x40] sm:$0xff] %vm562_vm5, %v1952_v57 }
 0x187   : > { %v2556_v61 = vpop.f32.mrf.mxu0 }
 0x188   : > { %1993 = vst.msk [vmem:[%s3137_s21 + $0x30] sm:$0xff] %vm562_vm5, %v1984_v60 }
 0x189   : > { %v1969_v62 = vld [vmem:[#allocation2 + $0x38] sm:$0xff] }
 0x18a   : > { %v1985_v63 = vadd.f32 %v3131_v0, %v1969_v62 }
 0x18c   : > { %1994 = vst.msk [vmem:[%s3137_s21 + $0x38] sm:$0xff] %vm562_vm5, %v1985_v63 }
 0x18d   : > { %v1970_v2 = vld [vmem:[#allocation2 + $0x40] sm:$0xff] }
 0x18e   : > { %v1986_v3 = vadd.f32 %v3131_v0, %v1970_v2 }
 0x190   : > { %1995 = vst.msk [vmem:[%s3137_s21 + $0x40] sm:$0xff] %vm562_vm5, %v1986_v3 }
 0x191 PF: > { %s16_s23 = sadd.s32 1, %s2655_s23   ;;  %s3193_s21 = smov %s2651_s22 }
 0x192   : > { %p13_p5 = scmp.ge.s32.totalorder %s16_s23, 4   ;;  %s3194_s22 = smov %s3196_s24 }
 0x194   :  { %15 = sbr.rel (!%p13_p5) target bundleno = 2 (0x2), region = 97 }

</bundles_post_ra>
